<compile_context>
chip_gen: v7x
topology: tpu7x:2x2x1
jax: 0.10.0
libtpu: 0.0.40
codegen_flags: <defaults>
</compile_context>

<pallas_src>
import functools

import jax
import jax.numpy as jnp
from jax import lax
from jax.experimental import pallas as pl
from jax.experimental.pallas import tpu as pltpu


# ----------------------------- Pallas kernel ---------------------------------

def _conv_relu_kernel(x_ref, w_ref, b_ref, o_ref, *, k, dilation, wp, lpad):
    """Fused Conv2d(+bias) + ReLU for one batch element.

    x_ref: (1, C_in, Lpad)    zero-padded image, (Hp*Wp) flattened onto lanes
    w_ref: (k*k, C_out, C_in) per-tap weight slices, tap t = kh*k + kw
    b_ref: (C_out, 1)         bias column
    o_ref: (1, C_out, Lpad)   output in the same padded-flat layout
    """
    x = x_ref[0]                                                    # (C_in, Lpad)
    acc = None
    for t in range(k * k):                                          # static unrolled loop
        kh, kw = t // k, t % k
        s = dilation * (kh * wp + kw)
        # lane rotation so that shifted[:, p] == x[:, p + s] for every valid output p
        shifted = x if s == 0 else pltpu.roll(x, shift=lpad - s, axis=1)
        contrib = jnp.dot(w_ref[t], shifted,
                          preferred_element_type=jnp.float32)       # (C_out, Lpad) on MXU
        acc = contrib if acc is None else acc + contrib
    out = jnp.maximum(acc + b_ref[...], 0.0)                        # bias + ReLU
    o_ref[...] = out[None].astype(o_ref.dtype)


# ------------------------------ wrapper / glue --------------------------------

def basic_block_forward(x, weight, bias, *, kernel_size=3, stride=1, padding=1,
                        dilation=1):
    B, C_in, H, W = x.shape
    C_out = weight.shape[0]
    k = kernel_size
    f32 = jnp.float32

    Hp, Wp = H + 2 * padding, W + 2 * padding
    Hout = (Hp - dilation * (k - 1) - 1) // stride + 1
    Wout = (Wp - dilation * (k - 1) - 1) // stride + 1

    # zero-pad spatially, flatten (Hp, Wp) onto lanes, pad lanes to a multiple of 128
    L = Hp * Wp
    Lpad = ((L + 127) // 128) * 128
    xp = jnp.pad(x.astype(f32), ((0, 0), (0, 0), (padding, padding), (padding, padding)))
    x_flat = jnp.pad(xp.reshape(B, C_in, L), ((0, 0), (0, 0), (0, Lpad - L)))

    # per-tap weight slices (tap-major) and bias column -- index plumbing only
    w_taps = jnp.transpose(weight.astype(f32), (2, 3, 0, 1)).reshape(k * k, C_out, C_in)
    b_col = bias.astype(f32).reshape(C_out, 1)

    out_flat = pl.pallas_call(
        functools.partial(_conv_relu_kernel, k=k, dilation=dilation, wp=Wp, lpad=Lpad),
        out_shape=jax.ShapeDtypeStruct((B, C_out, Lpad), f32),
        grid=(B,),
        in_specs=[
            pl.BlockSpec((1, C_in, Lpad), lambda b: (b, 0, 0)),       # one image per step
            pl.BlockSpec((k * k, C_out, C_in), lambda b: (0, 0, 0)),  # weights resident
            pl.BlockSpec((C_out, 1), lambda b: (0, 0)),               # bias resident
        ],
        out_specs=pl.BlockSpec((1, C_out, Lpad), lambda b: (b, 0, 0)),
        compiler_params=pltpu.CompilerParams(dimension_semantics=("parallel",)),
    )(x_flat, w_taps, b_col)

    # extract the valid output pixels from the padded-flat layout (indexing only)
    out_img = out_flat[:, :, :L].reshape(B, C_out, Hp, Wp)
    return out_img[:, :, 0:stride * (Hout - 1) + 1:stride,
                   0:stride * (Wout - 1) + 1:stride]


# ------------------------------- pure-JAX reference ---------------------------

def reference_forward(x, weight, bias, *, kernel_size=3, stride=1, padding=1,
                      dilation=1):
    out = lax.conv_general_dilated(
        x.astype(jnp.float32), weight.astype(jnp.float32),
        window_strides=(stride, stride),
        padding=[(padding, padding), (padding, padding)],
        rhs_dilation=(dilation, dilation),
        dimension_numbers=("NCHW", "OIHW", "NCHW"),
        precision=lax.Precision.HIGHEST)
    out = out + bias.reshape(1, -1, 1, 1)
    return jnp.maximum(out, 0.0)


# ------------------------------------ main ------------------------------------

if __name__ == "__main__":
    jax.config.update("jax_default_matmul_precision", "highest")
    key = jax.random.PRNGKey(0)
    kx, kw, kb = jax.random.split(key, 3)

    B, C_in, C_out, H, W = 2, 4, 8, 16, 16
    ksz, stride, padding, dilation = 3, 1, 1, 1

    x = jax.random.normal(kx, (B, C_in, H, W), jnp.float32)
    fan_in = C_in * ksz * ksz
    bound = 1.0 / float(fan_in) ** 0.5
    weight = bound * jax.random.normal(kw, (C_out, C_in, ksz, ksz), jnp.float32)
    bias = jax.random.uniform(kb, (C_out,), jnp.float32, -bound, bound)

    out = basic_block_forward(x, weight, bias, kernel_size=ksz, stride=stride,
                              padding=padding, dilation=dilation)
    out = jax.block_until_ready(out)

    ref = reference_forward(x, weight, bias, kernel_size=ksz, stride=stride,
                            padding=padding, dilation=dilation)
    assert out.shape == ref.shape, (out.shape, ref.shape)
    max_err = float(jnp.max(jnp.abs(out - ref)))
    assert jnp.allclose(out, ref, rtol=2e-3, atol=2e-3), max_err
    print("KERNEL_OK")
</pallas_src>

<mosaic_0001>
module attributes {stable_mosaic.version = 11 : i64} {
  func.func @_conv_relu_kernel(%arg0: i32, %arg1: memref<1x4x384xf32, #tpu.memory_space<vmem>>, %arg2: memref<9x8x4xf32, #tpu.memory_space<vmem>>, %arg3: memref<8x1xf32, #tpu.memory_space<vmem>>, %arg4: memref<1x8x384xf32, #tpu.memory_space<vmem>>) attributes {dimension_semantics = [#tpu.dimension_semantics<parallel>], iteration_bounds = array<i64: 2>, scalar_prefetch = 0 : i64, scratch_operands = 0 : i64, tpu.core_type = #tpu.core_type<tc>, window_params = [{transform_indices = @transform_0, window_bounds = array<i64: 1, 4, 384>}, {pipeline_mode = #tpu.pipeline_mode<synchronous>, transform_indices = @transform_1, window_bounds = array<i64: 9, 8, 4>}, {pipeline_mode = #tpu.pipeline_mode<synchronous>, transform_indices = @transform_2, window_bounds = array<i64: 8, 1>}, {transform_indices = @transform_3, window_bounds = array<i64: 1, 8, 384>}]} {
    %c0 = arith.constant 0 : index
    %c0_0 = arith.constant 0 : index
    %c0_1 = arith.constant 0 : index
    %0 = vector.load %arg1[%c0, %c0_0, %c0_1] : memref<1x4x384xf32, #tpu.memory_space<vmem>>, vector<1x4x384xf32>
    %1 = vector.shape_cast %0 : vector<1x4x384xf32> to vector<4x384xf32>
    %c0_2 = arith.constant 0 : index
    %c0_3 = arith.constant 0 : index
    %c0_4 = arith.constant 0 : index
    %2 = vector.load %arg2[%c0_2, %c0_3, %c0_4] : memref<9x8x4xf32, #tpu.memory_space<vmem>>, vector<1x8x4xf32>
    %3 = vector.shape_cast %2 : vector<1x8x4xf32> to vector<8x4xf32>
    %cst = arith.constant dense<0.000000e+00> : vector<8x384xf32>
    %4 = tpu.matmul %3, %1, %cst {dimension_numbers = #tpu.dot_dimension_numbers<[1], [0], [0], [1], [0, 0, 1, 1], [], []>, precision = #tpu.contract_precision<fp32>} : vector<8x4xf32>, vector<4x384xf32>, vector<8x384xf32> -> vector<8x384xf32>
    %c383_i32 = arith.constant 383 : i32
    %5 = tpu.dynamic_rotate %1 by %c383_i32 dim 1 : vector<4x384xf32>, i32 -> vector<4x384xf32>
    %c1 = arith.constant 1 : index
    %c0_5 = arith.constant 0 : index
    %c0_6 = arith.constant 0 : index
    %6 = vector.load %arg2[%c1, %c0_5, %c0_6] : memref<9x8x4xf32, #tpu.memory_space<vmem>>, vector<1x8x4xf32>
    %7 = vector.shape_cast %6 : vector<1x8x4xf32> to vector<8x4xf32>
    %cst_7 = arith.constant dense<0.000000e+00> : vector<8x384xf32>
    %8 = tpu.matmul %7, %5, %cst_7 {dimension_numbers = #tpu.dot_dimension_numbers<[1], [0], [0], [1], [0, 0, 1, 1], [], []>, precision = #tpu.contract_precision<fp32>} : vector<8x4xf32>, vector<4x384xf32>, vector<8x384xf32> -> vector<8x384xf32>
    %9 = arith.addf %4, %8 : vector<8x384xf32>
    %c382_i32 = arith.constant 382 : i32
    %10 = tpu.dynamic_rotate %1 by %c382_i32 dim 1 : vector<4x384xf32>, i32 -> vector<4x384xf32>
    %c2 = arith.constant 2 : index
    %c0_8 = arith.constant 0 : index
    %c0_9 = arith.constant 0 : index
    %11 = vector.load %arg2[%c2, %c0_8, %c0_9] : memref<9x8x4xf32, #tpu.memory_space<vmem>>, vector<1x8x4xf32>
    %12 = vector.shape_cast %11 : vector<1x8x4xf32> to vector<8x4xf32>
    %cst_10 = arith.constant dense<0.000000e+00> : vector<8x384xf32>
    %13 = tpu.matmul %12, %10, %cst_10 {dimension_numbers = #tpu.dot_dimension_numbers<[1], [0], [0], [1], [0, 0, 1, 1], [], []>, precision = #tpu.contract_precision<fp32>} : vector<8x4xf32>, vector<4x384xf32>, vector<8x384xf32> -> vector<8x384xf32>
    %14 = arith.addf %9, %13 : vector<8x384xf32>
    %c366_i32 = arith.constant 366 : i32
    %15 = tpu.dynamic_rotate %1 by %c366_i32 dim 1 : vector<4x384xf32>, i32 -> vector<4x384xf32>
    %c3 = arith.constant 3 : index
    %c0_11 = arith.constant 0 : index
    %c0_12 = arith.constant 0 : index
    %16 = vector.load %arg2[%c3, %c0_11, %c0_12] : memref<9x8x4xf32, #tpu.memory_space<vmem>>, vector<1x8x4xf32>
    %17 = vector.shape_cast %16 : vector<1x8x4xf32> to vector<8x4xf32>
    %cst_13 = arith.constant dense<0.000000e+00> : vector<8x384xf32>
    %18 = tpu.matmul %17, %15, %cst_13 {dimension_numbers = #tpu.dot_dimension_numbers<[1], [0], [0], [1], [0, 0, 1, 1], [], []>, precision = #tpu.contract_precision<fp32>} : vector<8x4xf32>, vector<4x384xf32>, vector<8x384xf32> -> vector<8x384xf32>
    %19 = arith.addf %14, %18 : vector<8x384xf32>
    %c365_i32 = arith.constant 365 : i32
    %20 = tpu.dynamic_rotate %1 by %c365_i32 dim 1 : vector<4x384xf32>, i32 -> vector<4x384xf32>
    %c4 = arith.constant 4 : index
    %c0_14 = arith.constant 0 : index
    %c0_15 = arith.constant 0 : index
    %21 = vector.load %arg2[%c4, %c0_14, %c0_15] : memref<9x8x4xf32, #tpu.memory_space<vmem>>, vector<1x8x4xf32>
    %22 = vector.shape_cast %21 : vector<1x8x4xf32> to vector<8x4xf32>
    %cst_16 = arith.constant dense<0.000000e+00> : vector<8x384xf32>
    %23 = tpu.matmul %22, %20, %cst_16 {dimension_numbers = #tpu.dot_dimension_numbers<[1], [0], [0], [1], [0, 0, 1, 1], [], []>, precision = #tpu.contract_precision<fp32>} : vector<8x4xf32>, vector<4x384xf32>, vector<8x384xf32> -> vector<8x384xf32>
    %24 = arith.addf %19, %23 : vector<8x384xf32>
    %c364_i32 = arith.constant 364 : i32
    %25 = tpu.dynamic_rotate %1 by %c364_i32 dim 1 : vector<4x384xf32>, i32 -> vector<4x384xf32>
    %c5 = arith.constant 5 : index
    %c0_17 = arith.constant 0 : index
    %c0_18 = arith.constant 0 : index
    %26 = vector.load %arg2[%c5, %c0_17, %c0_18] : memref<9x8x4xf32, #tpu.memory_space<vmem>>, vector<1x8x4xf32>
    %27 = vector.shape_cast %26 : vector<1x8x4xf32> to vector<8x4xf32>
    %cst_19 = arith.constant dense<0.000000e+00> : vector<8x384xf32>
    %28 = tpu.matmul %27, %25, %cst_19 {dimension_numbers = #tpu.dot_dimension_numbers<[1], [0], [0], [1], [0, 0, 1, 1], [], []>, precision = #tpu.contract_precision<fp32>} : vector<8x4xf32>, vector<4x384xf32>, vector<8x384xf32> -> vector<8x384xf32>
    %29 = arith.addf %24, %28 : vector<8x384xf32>
    %c348_i32 = arith.constant 348 : i32
    %30 = tpu.dynamic_rotate %1 by %c348_i32 dim 1 : vector<4x384xf32>, i32 -> vector<4x384xf32>
    %c6 = arith.constant 6 : index
    %c0_20 = arith.constant 0 : index
    %c0_21 = arith.constant 0 : index
    %31 = vector.load %arg2[%c6, %c0_20, %c0_21] : memref<9x8x4xf32, #tpu.memory_space<vmem>>, vector<1x8x4xf32>
    %32 = vector.shape_cast %31 : vector<1x8x4xf32> to vector<8x4xf32>
    %cst_22 = arith.constant dense<0.000000e+00> : vector<8x384xf32>
    %33 = tpu.matmul %32, %30, %cst_22 {dimension_numbers = #tpu.dot_dimension_numbers<[1], [0], [0], [1], [0, 0, 1, 1], [], []>, precision = #tpu.contract_precision<fp32>} : vector<8x4xf32>, vector<4x384xf32>, vector<8x384xf32> -> vector<8x384xf32>
    %34 = arith.addf %29, %33 : vector<8x384xf32>
    %c347_i32 = arith.constant 347 : i32
    %35 = tpu.dynamic_rotate %1 by %c347_i32 dim 1 : vector<4x384xf32>, i32 -> vector<4x384xf32>
    %c7 = arith.constant 7 : index
    %c0_23 = arith.constant 0 : index
    %c0_24 = arith.constant 0 : index
    %36 = vector.load %arg2[%c7, %c0_23, %c0_24] : memref<9x8x4xf32, #tpu.memory_space<vmem>>, vector<1x8x4xf32>
    %37 = vector.shape_cast %36 : vector<1x8x4xf32> to vector<8x4xf32>
    %cst_25 = arith.constant dense<0.000000e+00> : vector<8x384xf32>
    %38 = tpu.matmul %37, %35, %cst_25 {dimension_numbers = #tpu.dot_dimension_numbers<[1], [0], [0], [1], [0, 0, 1, 1], [], []>, precision = #tpu.contract_precision<fp32>} : vector<8x4xf32>, vector<4x384xf32>, vector<8x384xf32> -> vector<8x384xf32>
    %39 = arith.addf %34, %38 : vector<8x384xf32>
    %c346_i32 = arith.constant 346 : i32
    %40 = tpu.dynamic_rotate %1 by %c346_i32 dim 1 : vector<4x384xf32>, i32 -> vector<4x384xf32>
    %c8 = arith.constant 8 : index
    %c0_26 = arith.constant 0 : index
    %c0_27 = arith.constant 0 : index
    %41 = vector.load %arg2[%c8, %c0_26, %c0_27] : memref<9x8x4xf32, #tpu.memory_space<vmem>>, vector<1x8x4xf32>
    %42 = vector.shape_cast %41 : vector<1x8x4xf32> to vector<8x4xf32>
    %cst_28 = arith.constant dense<0.000000e+00> : vector<8x384xf32>
    %43 = tpu.matmul %42, %40, %cst_28 {dimension_numbers = #tpu.dot_dimension_numbers<[1], [0], [0], [1], [0, 0, 1, 1], [], []>, precision = #tpu.contract_precision<fp32>} : vector<8x4xf32>, vector<4x384xf32>, vector<8x384xf32> -> vector<8x384xf32>
    %44 = arith.addf %39, %43 : vector<8x384xf32>
    %c0_29 = arith.constant 0 : index
    %c0_30 = arith.constant 0 : index
    %45 = vector.load %arg3[%c0_29, %c0_30] : memref<8x1xf32, #tpu.memory_space<vmem>>, vector<8x1xf32>
    %46 = vector.broadcast %45 : vector<8x1xf32> to vector<8x384xf32>
    %47 = arith.addf %44, %46 : vector<8x384xf32>
    %cst_31 = arith.constant 0.000000e+00 : f32
    %48 = vector.broadcast %cst_31 : f32 to vector<8x384xf32>
    %49 = arith.maximumf %47, %48 : vector<8x384xf32>
    %50 = vector.shape_cast %49 : vector<8x384xf32> to vector<1x8x384xf32>
    %c0_32 = arith.constant 0 : index
    %c0_33 = arith.constant 0 : index
    %c0_34 = arith.constant 0 : index
    %51 = vector.load %arg4[%c0_32, %c0_33, %c0_34] : memref<1x8x384xf32, #tpu.memory_space<vmem>>, vector<1x8x384xf32>
    tpu.vector_store %arg4[%c0_32, %c0_33, %c0_34], %50 {strides = array<i32>} : memref<1x8x384xf32, #tpu.memory_space<vmem>>, vector<1x8x384xf32>,
    return
  }
  func.func @transform_0(%arg0: i32) -> (i32, i32, i32) {
    %c0_i32 = arith.constant 0 : i32
    %c0_i32_0 = arith.constant 0 : i32
    %c0_i32_1 = arith.constant 0 : i32
    return %arg0, %c0_i32, %c0_i32_0 : i32, i32, i32
  }
  func.func @transform_1(%arg0: i32) -> (i32, i32, i32) {
    %c0_i32 = arith.constant 0 : i32
    %c0_i32_0 = arith.constant 0 : i32
    %c0_i32_1 = arith.constant 0 : i32
    %c0_i32_2 = arith.constant 0 : i32
    return %c0_i32, %c0_i32_0, %c0_i32_1 : i32, i32, i32
  }
  func.func @transform_2(%arg0: i32) -> (i32, i32) {
    %c0_i32 = arith.constant 0 : i32
    %c0_i32_0 = arith.constant 0 : i32
    %c0_i32_1 = arith.constant 0 : i32
    return %c0_i32, %c0_i32_0 : i32, i32
  }
  func.func @transform_3(%arg0: i32) -> (i32, i32, i32) {
    %c0_i32 = arith.constant 0 : i32
    %c0_i32_0 = arith.constant 0 : i32
    %c0_i32_1 = arith.constant 0 : i32
    return %arg0, %c0_i32, %c0_i32_0 : i32, i32, i32
  }
}

</mosaic_0001>

<bundles_post_ra>
// kernel: tpu_custom_call.1
= control target key start
LH: loop header
LB: loop body
LE: loop exit
PB: predicated region body
PF: predicated region fallthrough
CT: control target
= control target key end

     0   :  { %8 = vsyncpa [#allocation3], 0  ;;  %s10396_s0 = inlined_call_operand.vmem [shape: f32[2,4,384], index: 0, kind: input, shape index: {}]   ;;  %s10397_s1 = inlined_call_operand.vmem [shape: f32[9,8,4], index: 1, kind: input, shape index: {}]   ;;  %s10398_s2 = inlined_call_operand.vmem [shape: f32[8,1], index: 2, kind: input, shape index: {}]   ;;  %s10399_s3 = inlined_call_operand.hbm [shape: f32[2,8,384], index: 3, kind: output, shape index: {}]  }
   0x1   :  { %10 = vsyncpa [#allocation3 + $0x1], 0  ;;  %s9341_s12 = smov 0   ;;  %s9343_s13 = smov 0  }
   0x2   :  { %s9345_s14 = smov 0   ;;  %s9347_s15 = smov 0  }
   0x3 LB: > { %s9362_s16 = sadd.s32 4294967295, %s9307_s15   ;;  %s8690_s17 = sadd.s32 4294967294, %s9307_s15   ;;  %s9307_s15 = sphi %s9347_s15, %s10405_s15   ;;  %s9303_s14 = sphi %s9345_s14, %s10404_s14   ;;  %s9299_s13 = sphi %s9343_s13, %s10403_s13   ;;  %s9295_s12 = sphi %s9341_s12, %s10402_s12  }
   0x4   : > { %s9366_s18 = sadd.s32 1, %s9307_s15   ;;  %s91_s19 = sadd.s32 1, %s9303_s14 }
   0x5   : > { %s88_s20 = ssub.s32 %s9307_s15, %s9366_s18  ;;  %p101_p0 = scmp.ne.s32.totalorder %s9303_s14, %s9299_s13 }
   0x6   : > { %p89_p1 = scmp.eq.s32.totalorder %s88_s20, 0  ;;  %p102_p2 = scmp.eq.s32.totalorder %s9362_s16, 1 }
   0x7   : > { %p107_p3 = scmp.ne.s32.totalorder %s9299_s13, %s9295_s12  ;;  %p108_p4 = scmp.eq.s32.totalorder %s8690_s17, 1 }
   0x8   : > { %s9377_s21 = scalar_select %p89_p1, %s9303_s14, %s91_s19  }
   0x9   : > { %p9379_p5 = por %p102_p2, %p101_p0  ;;  %p9383_p6 = por %p108_p4, %p107_p3 }
   0xa   : > { %p8693_p7 = scmp.ge.s32.totalorder %s9307_s15, 1  ;;  %p140_p8 = scmp.lt.s32.totalorder %s9307_s15, 3 }
   0xc   : > { %p141_p9 = pnand %p8693_p7, %p140_p8 }
   0xd   : > { %p164_p10 = scmp.lt.s32.totalorder (!%p141_p9), %s9362_s16, 1  ;;  %v9309_v0 = vmov (!%p141_p9), 0.0   ;;  %s9310_s29 = smov (!%p141_p9), 127   ;;  %vm9311_vm0 = vmmov (!%p141_p9), 0   ;;  %v8695_v4 = vld [vmem:[%s10397_s1 + $0x8] sm:$0xff] (!%p141_p9)  ;;  %vm190_vm1 = vcmask (!%p141_p9), 31744   ;;  %v182_v6 = vlaneseq (!%p141_p9) }
   0xe   : > { %144 = sbr.rel (%p141_p9) target bundleno = 809 (0x329), region = 32  ;;  %8814 = vmatprep.subr.mxu1 (!%p141_p9), %v9309_v0  ;;  %270 = vmatprep.mubr.f32.mxu0 (!%p141_p9), %v9309_v0  ;;  %s9312_s30 = smov (!%p141_p9), 126   ;;  %v192_v5 = vsel (!%p141_p9), %vm190_vm1, %v8695_v4, 0  ;;  %vm194_vm3 = vcmask (!%p141_p9), 1043456   ;;  %v171_v42 = vld [vmem:[%s10397_s1] sm:$0xff] (!%p141_p9) }
   0xf   : > { %8816 = vmatprep.mubr.msk.f32.mxu1 (!%p141_p9), %vm9311_vm0, %v9309_v0  ;;  %s9313_s4 = smov (!%p141_p9), 110   ;;  %s9314_s5 = smov (!%p141_p9), 109   ;;  %v9434_v7 = vand.u32 (!%p141_p9), 4294901760, %v192_v5  ;;  %v9436_v8 = vand.u32 (!%p141_p9), 127, %v182_v6  ;;  %v1116_v47 = vsel (!%p141_p9), %vm190_vm1, %v171_v42, 0 }
  0x10   : > { %s9315_s6 = smov (!%p141_p9), 108   ;;  %s9316_s7 = smov (!%p141_p9), 92   ;;  %v9515_v52 = vand.u32 (!%p141_p9), 4294901760, %v1116_v47 }
  0x11   : > { %s9317_s8 = smov (!%p141_p9), 91   ;;  %s9318_s9 = smov (!%p141_p9), 90   ;;  %v9439_v9 = vsub.f32 (!%p141_p9), %v192_v5, %v9434_v7  ;;  %vm184_vm2 = vcmp.lt.s32.totalorder (!%p141_p9), %v9436_v8, 127  ;;  %vm2979_vm4 = vcmp.lt.s32.totalorder (!%p141_p9), %v9436_v8, 110  ;;  %vm3917_vm5 = vcmp.lt.s32.totalorder (!%p141_p9), %v9436_v8, 109 }
  0x12   : > { %v9534_v56 = vsub.f32 (!%p141_p9), %v1116_v47, %v9515_v52  ;;  %vm4855_vm6 = vcmp.lt.s32.totalorder (!%p141_p9), %v9436_v8, 108  ;;  %vm2041_vm7 = vcmp.lt.s32.totalorder (!%p141_p9), %v9436_v8, 126  ;;  %vm5793_vm8 = vcmp.lt.s32.totalorder (!%p141_p9), %v9436_v8, 92  ;;  %s161_s17 = sand.u32 (!%p141_p9), 1, %s9299_s13  }
  0x13   : > { %v9443_v11 = vand.u32 (!%p141_p9), 4294901760, %v9439_v9  ;;  %vm6731_vm9 = vcmp.lt.s32.totalorder (!%p141_p9), %v9436_v8, 91  ;;  %vm7669_vm10 = vcmp.lt.s32.totalorder (!%p141_p9), %v9436_v8, 90  ;;  %s9190_s19 = smul.u32 (!%p141_p9), 24, %s161_s17 }
  0x14   : > { %v9548_v60 = vand.u32 (!%p141_p9), 4294901760, %v9534_v56 }
  0x15   : > { %s165_s24 = scalar_select %p164_p10, %s9362_s16, 1  ;;  %v274_v17 = vsub.f32 %v9439_v9, %v9443_v11 }
  0x16   : > { %v1194_v5 = vsub.f32 %v9534_v56, %v9548_v60  ;;  %s163_s20 = scalar_lea.vmem [#allocation2], %s9190_s19 }
  0x17   : > { %s9191_s25 = smul.u32 12, %s165_s24  ;;  %v275_v27 = vand.u32 4294901760, %v274_v17 }
  0x18   : > { %s9192_s24 = smul.u32 384, %s9362_s16 }
  0x19   : > { %s168_s28 = scalar_lea.vmem %s10396_s0, %s9191_s25  ;;  %s8631_s25 = sshll.u32 %s163_s20, 4  ;;  %s10356_s25 = int_to_ptr.vmem [resolvable:$true] %s8631_s25 }
  0x1a   : > { %v9396_v1 = vld [vmem:[%s168_s28] sm:$0xff]  ;;  %v9406_v3 = vld [vmem:[%s168_s28 + $0x8] sm:$0xf]  ;;  %s10354_s28 = scalar_lea.hbm %s10399_s3, %s9192_s24  ;;  %s9245_s16 = scalar_lea.vmem %s10356_s25, 384 }
  0x1b   : > { %176 = vrot.lane.b32.xlu1 %v9396_v1, %s9310_s29  ;;  %v9401_v2 = vcombine.high %v9396_v1, %v9396_v1  ;;  %v1122_v45 = vsel %vm194_vm3, %v9406_v3, 0  ;;  %v1118_v6 = vsel %vm194_vm3, %v9396_v1, 0  ;;  %p9246_p11 = scmp.ne.s32.totalorder %s10356_s25, %s9245_s16 }
  0x1c   : > { %v9503_v49 = vand.u32 4294901760, %v1122_v45 }
  0x1d   : > { %178 = vrot.lane.b32.xlu0 %v9401_v2, %s9310_s29  ;;  %v1120_v63 = vsel %vm194_vm3, %v9401_v2, 0  ;;  %p9247_p12 = pnand %p9246_p11, %p9379_p5 }
  0x1e   : > { %v9530_v54 = vsub.f32 %v1122_v45, %v9503_v49  ;;  %v9571_v4 = vand.u32 4294901760, %v1120_v63 }
  0x1f   : > { %2037 = vrot.lane.b32.xlu1 %v9401_v2, %s9312_s30  ;;  %p9248_p13 = pneg %p9247_p12 }
  0x20   : > { %v1668_v57 = vand.u32 4294901760, %v9530_v54 }
  0x21   : > { %180 = vrot.lane.b32.xlu0 %v9406_v3, %s9310_s29  ;;  %s8617_s29 = scalar_lea.sflag [#allocation3], %s161_s17 }
  0x23   : > { %2035 = vrot.lane.b32.xlu1 %v9396_v1, %s9312_s30 }
  0x25   : > { %2039 = vrot.lane.b32.xlu0 %v9406_v3, %s9312_s30  ;;  %s9320_s30 = smov [#allocation2]  }
  0x27   : > { %2977 = vrot.lane.b32.xlu1 %v9406_v3, %s9313_s4 }
  0x29   : > { %2975 = vrot.lane.b32.xlu0 %v9401_v2, %s9313_s4 }
  0x2b   : > { %3913 = vrot.lane.b32.xlu1 %v9401_v2, %s9314_s5 }
  0x2d   : > { %2973 = vrot.lane.b32.xlu0 %v9396_v1, %s9313_s4  ;;  %s9249_s4 = sshll.u32 %s9320_s30, 4  ;;  %s9250_s4 = int_to_ptr.vmem [resolvable:$false] %s9249_s4 }
  0x2e   : > { %p9252_p0 = scmp.lt.s32.totalorder %s10356_s25, %s9250_s4 }
  0x2f   : > { %3911 = vrot.lane.b32.xlu1 %v9396_v1, %s9314_s5 }
  0x31   : > { %3915 = vrot.lane.b32.xlu0 %v9406_v3, %s9314_s5  ;;  %s9251_s5 = scalar_lea.vmem %s9250_s4, 768 }
  0x32   : > { %p9253_p1 = scmp.lt.s32.totalorder %s9251_s5, %s9245_s16 }
  0x33   : > { %4853 = vrot.lane.b32.xlu1 %v9406_v3, %s9315_s6 }
  0x34   : > { %p9254_p2 = por %p9253_p1, %p9252_p0 }
  0x35   : > { %4851 = vrot.lane.b32.xlu0 %v9401_v2, %s9315_s6 }
  0x36   : > { %p9255_p3 = pnand %p9254_p2, %p9248_p13 }
  0x37   : > { %5789 = vrot.lane.b32.xlu1 %v9401_v2, %s9316_s7 }
  0x39   : > { %4849 = vrot.lane.b32.xlu0 %v9396_v1, %s9315_s6 }
  0x3b   : > { %5787 = vrot.lane.b32.xlu1 %v9396_v1, %s9316_s7 }
  0x3d   : > { %5791 = vrot.lane.b32.xlu0 %v9406_v3, %s9316_s7 }
  0x3f   : > { %6729 = vrot.lane.b32.xlu1 %v9406_v3, %s9317_s8 }
  0x41   : > { %6727 = vrot.lane.b32.xlu0 %v9401_v2, %s9317_s8 }
  0x43   : > { %7665 = vrot.lane.b32.xlu1 %v9401_v2, %s9318_s9 }
  0x45   : > { %6725 = vrot.lane.b32.xlu0 %v9396_v1, %s9317_s8 }
  0x47   : > { %7663 = vrot.lane.b32.xlu1 %v9396_v1, %s9318_s9 }
  0x49   : > { %7667 = vrot.lane.b32.xlu0 %v9406_v3, %s9318_s9  ;;  %v1669_v3 = vsub.f32 %v9530_v54, %v1668_v57 }
  0x4b   : > { %v1670_v2 = vand.u32 4294901760, %v1669_v3 }
  0x8d   : > { %v177_v10 = vpop.permute.xlu1 %176 }
  0x8f   : > { %v179_v12 = vpop.permute.xlu0 %178 }
  0x90   : > { %v186_v13 = vsel %vm184_vm2, %v177_v10, %v179_v12 }
  0x91   : > { %v196_v14 = vsel %vm194_vm3, %v186_v13, 0  ;;  %v9446_v15 = vpop.permute.xlu1 %2037 }
  0x92   : > { %v9448_v16 = vand.u32 4294901760, %v196_v14 }
  0x93   : > { %v181_v18 = vpop.permute.xlu0 %180 }
  0x94   : > { %v9453_v19 = vsub.f32 %v196_v14, %v9448_v16  ;;  %v185_v20 = vsel %vm184_vm2, %v179_v12, %v181_v18  ;;  %v187_v21 = vsel %vm184_vm2, %v181_v18, %v177_v10  ;;  %v9587_v10 = vsub.f32 %v1120_v63, %v9571_v4 }
  0x95   : > { %v199_v22 = vsel %vm194_vm3, %v185_v20, 0  ;;  %v202_v23 = vsel %vm194_vm3, %v187_v21, 0  ;;  %v9457_v24 = vpop.permute.xlu1 %2035  ;;  %v9599_v12 = vand.u32 4294901760, %v1118_v6 }
  0x96   : > { %v9459_v25 = vand.u32 4294901760, %v199_v22  ;;  %v9461_v26 = vand.u32 4294901760, %v202_v23  ;;  %v290_v28 = vand.u32 4294901760, %v9453_v19  ;;  %v1204_v14 = vand.u32 4294901760, %v9587_v10 }
  0x97   : > { %v9464_v29 = vpop.permute.xlu0 %2039 }
  0x98   : > { %v283_v30 = vsub.f32 %v199_v22, %v9459_v25  ;;  %v747_v31 = vsub.f32 %v202_v23, %v9461_v26  ;;  %205 = vmatprep.subr.mxu0 %v9459_v25  ;;  %8815 = vmatpush3.msra.mxu1 %v9461_v26  ;;  %v291_v35 = vsub.f32 %v9453_v19, %v290_v28 }
  0x99   : > { %207 = vmatpush1.msra.mxu0 %v9448_v16  ;;  %8817 = vmatmul.mubr.f32.vlgmr.msra.gmra.mrb[0].mxu1 %v275_v27  ;;  %v9471_v32 = vpop.permute.xlu1 %2977  ;;  %v2044_v1 = vsel %vm2041_vm7, %v9464_v29, %v9457_v24  ;;  %v1205_v21 = vsub.f32 %v9587_v10, %v1204_v14 }
  0x9a   : > { %v748_v33 = vand.u32 4294901760, %v747_v31  ;;  %276 = vmatmul.mubr.f32.vlgmr.msra.gmra.mrb[0].mxu0 %v275_v27  ;;  %8819 = vmatprep.subr.mxu1 %v9309_v0  ;;  %v284_v34 = vand.u32 4294901760, %v283_v30  ;;  %v292_v43 = vand.u32 4294901760, %v291_v35  ;;  %v2057_v17 = vsel %vm194_vm3, %v2044_v1, 0 }
  0x9b   : > { %8821 = vmatprep.mubr.msk.f32.mxu1 %vm9311_vm0, %v9309_v0  ;;  %356 = vmatprep.mubr.f32.mxu0 %v9309_v0  ;;  %v9480_v36 = vpop.permute.xlu0 %2975  ;;  %v9616_v20 = vand.u32 4294901760, %v2057_v17  ;;  %v2043_v1 = vsel %vm2041_vm7, %v9457_v24, %v9446_v15 }
  0x9c   : > { %v285_v37 = vsub.f32 %v283_v30, %v284_v34  ;;  %v749_v38 = vsub.f32 %v747_v31, %v748_v33 }
  0x9d   : > { %v3914_v39 = vpop.permute.xlu1 %3913 }
  0x9e   : > { %v286_v40 = vand.u32 4294901760, %v285_v37  ;;  %v750_v41 = vand.u32 4294901760, %v749_v38 }
  0x9f   : > { %v9486_v44 = vpop.permute.xlu0 %2973 }
  0xa0   : > { %287 = vmatprep.subr.mxu0 %v286_v40  ;;  %8820 = vmatpush3.msra.mxu1 %v750_v41  ;;  %v9494_v46 = vsel %vm2979_vm4, %v9486_v44, %v9480_v36  ;;  %v8697_v41 = vld [vmem:[%s10397_s1 + $0x18] sm:$0xff]  ;;  %v2982_v42 = vsel %vm2979_vm4, %v9471_v32, %v9486_v44 }
  0xa1   : > { %293 = vmatpush1.msra.mxu0 %v292_v43  ;;  %8822 = vmatmul.mubr.f32.vlgmr.msra.gmra.mrb[2].mxu1 %v9434_v7  ;;  %v9501_v48 = vpop.permute.xlu1 %3911  ;;  %v2986_v43 = vsel %vm190_vm1, %v8697_v41, 0  ;;  %v2995_v45 = vsel %vm194_vm3, %v2982_v42, 0 }
  0xa2   : > { %8824 = vmatprep.subr.mxu1 %v9309_v0  ;;  %358 = vmatmul.mubr.f32.vlgmr.msra.gmra.mrb[0].mxu0 %v9434_v7  ;;  %v9508_v50 = vsel %vm3917_vm5, %v9501_v48, %v3914_v39  ;;  %v9701_v47 = vand.u32 4294901760, %v2986_v43  ;;  %v9705_v44 = vand.u32 4294901760, %v2995_v45 }
  0xa3   : > { %366 = vmatprep.subr.mxu0 %v283_v30  ;;  %8825 = vmatpush3.msra.mxu1 %v747_v31  ;;  %v9510_v51 = vpop.permute.xlu0 %3915 }
  0xa4   : > { %369 = vmatpush1.msra.mxu0 %v9453_v19  ;;  %8826 = vmatprep.mubr.msk.f32.mxu1 %vm9311_vm0, %v9309_v0  ;;  %v9520_v53 = vsel %vm3917_vm5, %v3914_v39, %v9510_v51  ;;  %v9614_v19 = vsub.f32 %v1118_v6, %v9599_v12  ;;  %v3920_v24 = vsel %vm3917_vm5, %v9510_v51, %v9501_v48 }
  0xa5   : > { %442 = vmatprep.subr.mxu0 %v9459_v25  ;;  %8829 = vmatprep.subr.mxu1 %v9309_v0  ;;  %v9541_v58 = vpop.permute.xlu1 %4853 }
  0xa6   : > { %8827 = vmatmul.mubr.f32.vlgmr.msra.gmra.mrb[4].mxu1 %v9439_v9  ;;  %432 = vmatprep.mubr.f32.mxu0 %v9309_v0  ;;  %v1210_v23 = vand.u32 4294901760, %v9614_v19 }
  0xa7   : > { %8830 = vmatpush3.msra.mxu1 %v9461_v26  ;;  %8831 = vmatprep.mubr.msk.f32.mxu1 %vm9311_vm0, %v9309_v0  ;;  %v4852_v55 = vpop.permute.xlu0 %4851 }
  0xa8   : > { %8834 = vmatprep.subr.mxu1 %v9309_v0  ;;  %v9553_v61 = vsel %vm4855_vm6, %v4852_v55, %v9541_v58 }
  0xaa   : > { %8832 = vmatmul.mubr.f32.vlgmr.msra.gmra.mrb[6].mxu1 %v9443_v11  ;;  %435 = vmatmul.mubr.f32.vlgmr.msra.gmra.mrb[0].mxu0 %v9439_v9  ;;  %v1195_v9 = vand.u32 4294901760, %v1194_v5 }
  0xab   : > { %8835 = vmatpush3.msra.mxu1 %v748_v33  ;;  %444 = vmatpush1.msra.mxu0 %v9448_v16  ;;  %v9543_v59 = vpop.permute.xlu0 %4849 }
  0xac   : > { %520 = vmatprep.subr.mxu0 %v284_v34  ;;  %8836 = vmatprep.mubr.msk.f32.mxu1 %vm9311_vm0, %v9309_v0  ;;  %v9558_v62 = vsel %vm4855_vm6, %v9543_v59, %v4852_v55  ;;  %v9720_v55 = vsub.f32 %v2995_v45, %v9705_v44 }
  0xad   : > { %8839 = vmatprep.subr.mxu1 %v9309_v0  ;;  %507 = vmatprep.mubr.f32.mxu0 %v9309_v0 }
  0xae   : > { %8837 = vmatmul.mubr.f32.vlgmr.msra.gmra.mrb[8].mxu1 %v9434_v7  ;;  %v3541_v3 = vand.u32 4294901760, %v9720_v55 }
  0xaf   : > { %8840 = vmatpush3.msra.mxu1 %v9461_v26  ;;  %8841 = vmatprep.mubr.msk.f32.mxu1 %vm9311_vm0, %v9309_v0  ;;  %v1206_v26 = vand.u32 4294901760, %v1205_v21  ;;  %v3933_v21 = vsel %vm194_vm3, %v3920_v24, 0 }
  0xb0   : > { %8844 = vmatprep.subr.mxu1 %v9309_v0 }
  0xb2   : > { %511 = vmatmul.mubr.f32.vlgmr.msra.gmra.mrb[0].mxu0 %v9443_v11  ;;  %8842 = vmatmul.mubr.f32.vlgmr.msra.gmra.mrb[10].mxu1 %v9434_v7  ;;  %v8696_v11 = vld [vmem:[%s10397_s1 + $0x10] sm:$0xff] }
  0xb3   : > { %524 = vmatpush1.msra.mxu0 %v290_v28  ;;  %587 = vmatprep.mubr.f32.mxu0 %v9309_v0  ;;  %v2048_v13 = vsel %vm190_vm1, %v8696_v11, 0  ;;  %v1211_v28 = vsub.f32 %v9614_v19, %v1210_v23 }
  0xb4   : > { %596 = vmatprep.subr.mxu0 %v9459_v25  ;;  %8845 = vmatpush3.msra.mxu1 %v9503_v49  ;;  %v9609_v18 = vand.u32 4294901760, %v2048_v13  ;;  %v9635_v25 = vsub.f32 %v2057_v17, %v9616_v20  ;;  %v2051_v17 = vsel %vm194_vm3, %v2043_v1, 0  ;;  %v2980_v1 = vsel %vm2979_vm4, %v9480_v36, %v9471_v32 }
  0xb5   : > { %8846 = vmatprep.mubr.msk.f32.mxu1 %vm9311_vm0, %v9309_v0  ;;  %8849 = vmatprep.subr.mxu1 %v9309_v0  ;;  %v1212_v37 = vand.u32 4294901760, %v1211_v28 }
  0xb6   : > { %8847 = vmatmul.mubr.f32.vlgmr.msra.gmra.mrb[12].mxu1 %v1195_v9  ;;  %v9628_v22 = vsub.f32 %v2048_v13, %v9609_v18  ;;  %v2603_v30 = vand.u32 4294901760, %v9635_v25 }
  0xb7   : > { %8850 = vmatpush3.msra.mxu1 %v1670_v2  ;;  %8851 = vmatprep.mubr.msk.f32.mxu1 %vm9311_vm0, %v9309_v0 }
  0xb8   : > { %8854 = vmatprep.subr.mxu1 %v9309_v0  ;;  %v9641_v27 = vand.u32 4294901760, %v9628_v22  ;;  %v2604_v38 = vsub.f32 %v9635_v25, %v2603_v30 }
  0xba   : > { %589 = vmatmul.mubr.f32.vlgmr.msra.gmra.mrb[0].mxu0 %v9434_v7  ;;  %8852 = vmatmul.mubr.f32.vlgmr.msra.gmra.mrb[14].mxu1 %v9515_v52  ;;  %v2129_v35 = vsub.f32 %v9628_v22, %v9641_v27  ;;  %v2605_v40 = vand.u32 4294901760, %v2604_v38 }
  0xbb   : > { %598 = vmatpush1.msra.mxu0 %v9448_v16  ;;  %661 = vmatprep.mubr.f32.mxu0 %v9309_v0  ;;  %v5790_v16 = vpop.permute.xlu1 %5789 }
  0xbc   : > { %1125 = vmatprep.subr.mxu0 %v9571_v4  ;;  %8855 = vmatpush3.msra.mxu1 %v9530_v54  ;;  %v9678_v39 = vand.u32 4294901760, %v2129_v35  ;;  %v9714_v54 = vsub.f32 %v2986_v43, %v9701_v47 }
  0xbd   : > { %8856 = vmatprep.mubr.msk.f32.mxu1 %vm9311_vm0, %v9309_v0  ;;  %8859 = vmatprep.subr.mxu1 %v9309_v0 }
  0xbe   : > { %8857 = vmatmul.mubr.f32.vlgmr.msra.gmra.mrb[16].mxu1 %v9534_v56  ;;  %v9730_v63 = vand.u32 4294901760, %v9714_v54 }
  0xbf   : > { %8860 = vmatpush3.msra.mxu1 %v9503_v49  ;;  %8861 = vmatprep.mubr.msk.f32.mxu1 %vm9311_vm0, %v9309_v0  ;;  %v9650_v31 = vpop.permute.xlu1 %5787 }
  0xc0   : > { %8864 = vmatprep.subr.mxu1 %v9309_v0  ;;  %v9659_v33 = vsel %vm5793_vm8, %v9650_v31, %v5790_v16 }
  0xc2   : > { %663 = vmatmul.mubr.f32.vlgmr.msra.gmra.mrb[0].mxu0 %v9434_v7  ;;  %8862 = vmatmul.mubr.f32.vlgmr.msra.gmra.mrb[18].mxu1 %v9548_v60  ;;  %v9652_v7 = vpop.permute.xlu0 %5791 }
  0xc3   : > { %1127 = vmatpush1.msra.mxu0 %v9599_v12  ;;  %1190 = vmatprep.mubr.f32.mxu0 %v9309_v0  ;;  %v9664_v34 = vsel %vm5793_vm8, %v5790_v16, %v9652_v7  ;;  %v9736_v5 = vpop.permute.xlu1 %6729  ;;  %v9813_v16 = vand.u32 4294901760, %v3933_v21 }
  0xc4   : > { %1207 = vmatprep.subr.mxu0 %v1206_v26  ;;  %8865 = vmatpush3.msra.mxu1 %v1668_v57  ;;  %v2042_v57 = vsel %vm2041_vm7, %v9446_v15, %v9464_v29  ;;  %v8698_v15 = vld [vmem:[%s10397_s1 + $0x20] sm:$0xff] }
  0xc5   : > { %8866 = vmatprep.mubr.msk.f32.mxu1 %vm9311_vm0, %v9309_v0  ;;  %8869 = vmatprep.subr.mxu1 %v9309_v0  ;;  %v2054_v6 = vsel %vm194_vm3, %v2042_v57, 0  ;;  %v9832_v28 = vsub.f32 %v3933_v21, %v9813_v16  ;;  %v5796_v21 = vsel %vm5793_vm8, %v9652_v7, %v9650_v31 }
  0xc6   : > { %8867 = vmatmul.mubr.f32.vlgmr.msra.gmra.mrb[20].mxu1 %v9515_v52  ;;  %v9765_v11 = vand.u32 4294901760, %v2054_v6 }
  0xc7   : > { %8870 = vmatpush3.msra.mxu1 %v9503_v49  ;;  %8871 = vmatprep.mubr.msk.f32.mxu1 %vm9311_vm0, %v9309_v0  ;;  %v6728_v49 = vpop.permute.xlu0 %6727  ;;  %v4479_v38 = vand.u32 4294901760, %v9832_v28 }
  0xc8   : > { %8874 = vmatprep.subr.mxu1 %v9309_v0  ;;  %v9745_v29 = vsel %vm6731_vm9, %v6728_v49, %v9736_v5 }
  0xca   : > { %1196 = vmatmul.mubr.f32.vlgmr.msra.gmra.mrb[0].mxu0 %v1195_v9  ;;  %8872 = vmatmul.mubr.f32.vlgmr.msra.gmra.mrb[22].mxu1 %v9515_v52  ;;  %v3067_v9 = vsub.f32 %v9714_v54, %v9730_v63 }
  0xcb   : > { %1213 = vmatpush1.msra.mxu0 %v1212_v37  ;;  %1276 = vmatprep.mubr.f32.mxu0 %v9309_v0 }
  0xcc   : > { %1286 = vmatprep.subr.mxu0 %v9587_v10  ;;  %8875 = vmatpush3.msra.mxu1 %v9616_v20  ;;  %v3542_v10 = vsub.f32 %v9720_v55, %v3541_v3  ;;  %v9774_v13 = vand.u32 4294901760, %v3067_v9 }
  0xcd   : > { %8876 = vmatprep.mubr.msk.f32.mxu1 %vm9311_vm0, %v9309_v0  ;;  %8879 = vmatprep.subr.mxu1 %v9309_v0 }
  0xce   : > { %8877 = vmatmul.mubr.f32.vlgmr.msra.gmra.mrb[24].mxu1 %v9678_v39 }
  0xcf   : > { %8880 = vmatpush3.msra.mxu1 %v2605_v40  ;;  %8881 = vmatprep.mubr.msk.f32.mxu1 %vm9311_vm0, %v9309_v0 }
  0xd0   : > { %8884 = vmatprep.subr.mxu1 %v9309_v0 }
  0xd2   : > { %1278 = vmatmul.mubr.f32.vlgmr.msra.gmra.mrb[0].mxu0 %v9515_v52  ;;  %8882 = vmatmul.mubr.f32.vlgmr.msra.gmra.mrb[26].mxu1 %v9609_v18 }
  0xd3   : > { %1289 = vmatpush1.msra.mxu0 %v9614_v19  ;;  %1352 = vmatprep.mubr.f32.mxu0 %v9309_v0 }
  0xd4   : > { %1362 = vmatprep.subr.mxu0 %v9571_v4  ;;  %8885 = vmatpush3.msra.mxu1 %v9635_v25  ;;  %v7666_v25 = vpop.permute.xlu1 %7665 }
  0xd5   : > { %8886 = vmatprep.mubr.msk.f32.mxu1 %vm9311_vm0, %v9309_v0  ;;  %8889 = vmatprep.subr.mxu1 %v9309_v0 }
  0xd6   : > { %8887 = vmatmul.mubr.f32.vlgmr.msra.gmra.mrb[28].mxu1 %v9628_v22 }
  0xd7   : > { %8890 = vmatpush3.msra.mxu1 %v9616_v20  ;;  %8891 = vmatprep.mubr.msk.f32.mxu1 %vm9311_vm0, %v9309_v0 }
  0xd8   : > { %8894 = vmatprep.subr.mxu1 %v9309_v0  ;;  %v9847_v40 = vpop.permute.xlu1 %7663 }
  0xd9   : > { %v9856_v41 = vsel %vm7669_vm10, %v9847_v40, %v7666_v25 }
  0xda   : > { %1355 = vmatmul.mubr.f32.vlgmr.msra.gmra.mrb[0].mxu0 %v9534_v56  ;;  %8892 = vmatmul.mubr.f32.vlgmr.msra.gmra.mrb[30].mxu1 %v9641_v27  ;;  %v9738_v56 = vpop.permute.xlu0 %6725 }
  0xdb   : > { %1364 = vmatpush1.msra.mxu0 %v9599_v12  ;;  %1427 = vmatprep.mubr.f32.mxu0 %v9309_v0  ;;  %v9750_v2 = vsel %vm6731_vm9, %v9738_v56, %v6728_v49  ;;  %v4480_v49 = vsub.f32 %v9832_v28, %v4479_v38 }
  0xdc   : > { %1440 = vmatprep.subr.mxu0 %v1204_v14  ;;  %8895 = vmatpush3.msra.mxu1 %v2603_v30  ;;  %v3543_v14 = vand.u32 4294901760, %v3542_v10 }
  0xdd   : > { %8896 = vmatprep.mubr.msk.f32.mxu1 %vm9311_vm0, %v9309_v0  ;;  %8899 = vmatprep.subr.mxu1 %v9309_v0  ;;  %v4481_v57 = vand.u32 4294901760, %v4480_v49 }
  0xde   : > { %8897 = vmatmul.mubr.f32.vlgmr.msra.gmra.mrb[32].mxu1 %v9609_v18 }
  0xdf   : > { %8900 = vmatpush3.msra.mxu1 %v9616_v20  ;;  %8901 = vmatprep.mubr.msk.f32.mxu1 %vm9311_vm0, %v9309_v0  ;;  %v9781_v20 = vsub.f32 %v2054_v6, %v9765_v11 }
  0xe0   : > { %8904 = vmatprep.subr.mxu1 %v9309_v0 }
  0xe1   : > { %v2139_v19 = vand.u32 4294901760, %v9781_v20 }
  0xe2   : > { %1431 = vmatmul.mubr.f32.vlgmr.msra.gmra.mrb[0].mxu0 %v9548_v60  ;;  %8902 = vmatmul.mubr.f32.vlgmr.msra.gmra.mrb[34].mxu1 %v9609_v18  ;;  %v9796_v60 = vand.u32 4294901760, %v2051_v17 }
  0xe3   : > { %1444 = vmatpush1.msra.mxu0 %v1210_v23  ;;  %1507 = vmatprep.mubr.f32.mxu0 %v9309_v0  ;;  %v2140_v23 = vsub.f32 %v9781_v20, %v2139_v19 }
  0xe4   : > { %1516 = vmatprep.subr.mxu0 %v9571_v4  ;;  %8905 = vmatpush3.msra.mxu1 %v9705_v44  ;;  %v3924_v4 = vsel %vm190_vm1, %v8698_v15, 0  ;;  %v9809_v51 = vsub.f32 %v2051_v17, %v9796_v60  ;;  %v2992_v15 = vsel %vm194_vm3, %v2980_v1, 0 }
  0xe5   : > { %8906 = vmatprep.mubr.msk.f32.mxu1 %vm9311_vm0, %v9309_v0  ;;  %8909 = vmatprep.subr.mxu1 %v9309_v0  ;;  %v9806_v48 = vand.u32 4294901760, %v3924_v4  ;;  %v2141_v30 = vand.u32 4294901760, %v2140_v23 }
  0xe6   : > { %8907 = vmatmul.mubr.f32.vlgmr.msra.gmra.mrb[36].mxu1 %v9774_v13  ;;  %v2145_v26 = vand.u32 4294901760, %v9809_v51 }
  0xe7   : > { %8910 = vmatpush3.msra.mxu1 %v3543_v14  ;;  %8911 = vmatprep.mubr.msk.f32.mxu1 %vm9311_vm0, %v9309_v0 }
  0xe8   : > { %8914 = vmatprep.subr.mxu1 %v9309_v0  ;;  %v2146_v37 = vsub.f32 %v9809_v51, %v2145_v26 }
  0xea   : > { %1509 = vmatmul.mubr.f32.vlgmr.msra.gmra.mrb[0].mxu0 %v9515_v52  ;;  %8912 = vmatmul.mubr.f32.vlgmr.msra.gmra.mrb[38].mxu1 %v9701_v47  ;;  %v2147_v45 = vand.u32 4294901760, %v2146_v37 }
  0xeb   : > { %1518 = vmatpush1.msra.mxu0 %v9599_v12  ;;  %1581 = vmatprep.mubr.f32.mxu0 %v9309_v0  ;;  %v9825_v12 = vsub.f32 %v3924_v4, %v9806_v48 }
  0xec   : > { %2060 = vmatprep.subr.mxu0 %v9765_v11  ;;  %8915 = vmatpush3.msra.mxu1 %v9720_v55 }
  0xed   : > { %8916 = vmatprep.mubr.msk.f32.mxu1 %vm9311_vm0, %v9309_v0  ;;  %8919 = vmatprep.subr.mxu1 %v9309_v0  ;;  %v9838_v35 = vand.u32 4294901760, %v9825_v12 }
  0xee   : > { %8917 = vmatmul.mubr.f32.vlgmr.msra.gmra.mrb[40].mxu1 %v9714_v54 }
  0xef   : > { %8920 = vmatpush3.msra.mxu1 %v9705_v44  ;;  %8921 = vmatprep.mubr.msk.f32.mxu1 %vm9311_vm0, %v9309_v0  ;;  %v4005_v43 = vsub.f32 %v9825_v12, %v9838_v35 }
  0xf0   : > { %8924 = vmatprep.subr.mxu1 %v9309_v0 }
  0xf1   : > { %v9876_v55 = vand.u32 4294901760, %v4005_v43 }
  0xf2   : > { %1583 = vmatmul.mubr.f32.vlgmr.msra.gmra.mrb[0].mxu0 %v9515_v52  ;;  %8922 = vmatmul.mubr.f32.vlgmr.msra.gmra.mrb[42].mxu1 %v9730_v63  ;;  %v9849_v52 = vpop.permute.xlu0 %7667 }
  0xf3   : > { %2062 = vmatpush1.msra.mxu0 %v9796_v60  ;;  %2125 = vmatprep.mubr.f32.mxu0 %v9309_v0  ;;  %v9861_v42 = vsel %vm7669_vm10, %v7666_v25, %v9849_v52 }
  0xf4   : > { %2142 = vmatprep.subr.mxu0 %v2141_v30  ;;  %8925 = vmatpush3.msra.mxu1 %v3541_v3 }
  0xf5   : > { %8926 = vmatprep.mubr.msk.f32.mxu1 %vm9311_vm0, %v9309_v0  ;;  %8929 = vmatprep.subr.mxu1 %v9309_v0 }
  0xf6   : > { %8927 = vmatmul.mubr.f32.vlgmr.msra.gmra.mrb[44].mxu1 %v9701_v47 }
  0xf7   : > { %8930 = vmatpush3.msra.mxu1 %v9705_v44  ;;  %8931 = vmatprep.mubr.msk.f32.mxu1 %vm9311_vm0, %v9309_v0  ;;  %v8699_v44 = vld [vmem:[%s10397_s1 + $0x28] sm:$0xff] }
  0xf8   : > { %8934 = vmatprep.subr.mxu1 %v9309_v0  ;;  %v4862_v3 = vsel %vm190_vm1, %v8699_v44, 0 }
  0xf9   : > { %v9899_v9 = vand.u32 4294901760, %v4862_v3 }
  0xfa   : > { %2131 = vmatmul.mubr.f32.vlgmr.msra.gmra.mrb[0].mxu0 %v9678_v39  ;;  %8932 = vmatmul.mubr.f32.vlgmr.msra.gmra.mrb[46].mxu1 %v9701_v47  ;;  %v4858_v39 = vsel %vm4855_vm6, %v9541_v58, %v9543_v59 }
  0xfb   : > { %2148 = vmatpush1.msra.mxu0 %v2147_v45  ;;  %2211 = vmatprep.mubr.f32.mxu0 %v9309_v0  ;;  %v4871_v6 = vsel %vm194_vm3, %v4858_v39, 0  ;;  %v9912_v59 = vsub.f32 %v4862_v3, %v9899_v9  ;;  %v8701_v39 = vld [vmem:[%s10397_s1 + $0x38] sm:$0xff] }
  0xfc   : > { %2221 = vmatprep.subr.mxu0 %v9781_v20  ;;  %8935 = vmatpush3.msra.mxu1 %v9813_v16  ;;  %v9903_v58 = vand.u32 4294901760, %v4871_v6  ;;  %v6738_v3 = vsel %vm190_vm1, %v8701_v39, 0 }
  0xfd   : > { %8936 = vmatprep.mubr.msk.f32.mxu1 %vm9311_vm0, %v9309_v0  ;;  %8939 = vmatprep.subr.mxu1 %v9309_v0  ;;  %v9928_v14 = vand.u32 4294901760, %v9912_v59 }
  0xfe   : > { %8937 = vmatmul.mubr.f32.vlgmr.msra.gmra.mrb[48].mxu1 %v9876_v55  ;;  %v9918_v10 = vsub.f32 %v4871_v6, %v9903_v58 }
  0xff   : > { %8940 = vmatpush3.msra.mxu1 %v4481_v57  ;;  %8941 = vmatprep.mubr.msk.f32.mxu1 %vm9311_vm0, %v9309_v0  ;;  %v4943_v32 = vsub.f32 %v9912_v59, %v9928_v14 }
 0x100   : > { %8944 = vmatprep.subr.mxu1 %v9309_v0  ;;  %v5417_v17 = vand.u32 4294901760, %v9918_v10 }
 0x101   : > { %v9951_v20 = vand.u32 4294901760, %v4943_v32 }
 0x102   : > { %2213 = vmatmul.mubr.f32.vlgmr.msra.gmra.mrb[0].mxu0 %v9609_v18  ;;  %8942 = vmatmul.mubr.f32.vlgmr.msra.gmra.mrb[50].mxu1 %v9806_v48  ;;  %v5418_v36 = vsub.f32 %v9918_v10, %v5417_v17 }
 0x103   : > { %2224 = vmatpush1.msra.mxu0 %v9809_v51  ;;  %2287 = vmatprep.mubr.f32.mxu0 %v9309_v0 }
 0x104   : > { %2297 = vmatprep.subr.mxu0 %v9765_v11  ;;  %8945 = vmatpush3.msra.mxu1 %v9832_v28  ;;  %v5419_v24 = vand.u32 4294901760, %v5418_v36 }
 0x105   : > { %8946 = vmatprep.mubr.msk.f32.mxu1 %vm9311_vm0, %v9309_v0  ;;  %8949 = vmatprep.subr.mxu1 %v9309_v0 }
 0x106   : > { %8947 = vmatmul.mubr.f32.vlgmr.msra.gmra.mrb[52].mxu1 %v9825_v12 }
 0x107   : > { %8950 = vmatpush3.msra.mxu1 %v9813_v16  ;;  %8951 = vmatprep.mubr.msk.f32.mxu1 %vm9311_vm0, %v9309_v0 }
 0x108   : > { %8954 = vmatprep.subr.mxu1 %v9309_v0 }
 0x10a   : > { %2290 = vmatmul.mubr.f32.vlgmr.msra.gmra.mrb[0].mxu0 %v9628_v22  ;;  %8952 = vmatmul.mubr.f32.vlgmr.msra.gmra.mrb[54].mxu1 %v9838_v35  ;;  %v9946_v22 = vand.u32 4294901760, %v2992_v15 }
 0x10b   : > { %2299 = vmatpush1.msra.mxu0 %v9796_v60  ;;  %2362 = vmatprep.mubr.f32.mxu0 %v9309_v0 }
 0x10c   : > { %2375 = vmatprep.subr.mxu0 %v2139_v19  ;;  %8955 = vmatpush3.msra.mxu1 %v4479_v38  ;;  %v9957_v4 = vsub.f32 %v2992_v15, %v9946_v22  ;;  %v2989_v19 = vsel %vm194_vm3, %v9494_v46, 0  ;;  %v3930_v15 = vsel %vm194_vm3, %v9520_v53, 0 }
 0x10d   : > { %8956 = vmatprep.mubr.msk.f32.mxu1 %vm9311_vm0, %v9309_v0  ;;  %8959 = vmatprep.subr.mxu1 %v9309_v0  ;;  %v9974_v46 = vand.u32 4294901760, %v2989_v19  ;;  %v10099_v36 = vand.u32 4294901760, %v3930_v15 }
 0x10e   : > { %8957 = vmatmul.mubr.f32.vlgmr.msra.gmra.mrb[56].mxu1 %v9806_v48  ;;  %v3077_v51 = vand.u32 4294901760, %v9957_v4 }
 0x10f   : > { %8960 = vmatpush3.msra.mxu1 %v9813_v16  ;;  %8961 = vmatprep.mubr.msk.f32.mxu1 %vm9311_vm0, %v9309_v0  ;;  %v5809_v16 = vsel %vm194_vm3, %v5796_v21, 0  ;;  %v9987_v7 = vsub.f32 %v2989_v19, %v9974_v46  ;;  %v10112_v19 = vsub.f32 %v3930_v15, %v10099_v36 }
 0x110   : > { %8964 = vmatprep.subr.mxu1 %v9309_v0  ;;  %v9991_v23 = vand.u32 4294901760, %v5809_v16  ;;  %v3078_v25 = vsub.f32 %v9957_v4, %v3077_v51 }
 0x111   : > { %v4015_v21 = vand.u32 4294901760, %v10112_v19 }
 0x112   : > { %2366 = vmatmul.mubr.f32.vlgmr.msra.gmra.mrb[0].mxu0 %v9641_v27  ;;  %8962 = vmatmul.mubr.f32.vlgmr.msra.gmra.mrb[58].mxu1 %v9806_v48  ;;  %v8700_v27 = vld [vmem:[%s10397_s1 + $0x30] sm:$0xff]  ;;  %v6354_v28 = vsub.f32 %v5809_v16, %v9991_v23  ;;  %v3079_v30 = vand.u32 4294901760, %v3078_v25 }
 0x113   : > { %2379 = vmatpush1.msra.mxu0 %v2145_v26  ;;  %2442 = vmatprep.mubr.f32.mxu0 %v9309_v0  ;;  %v3083_v26 = vand.u32 4294901760, %v9987_v7 }
 0x114   : > { %2451 = vmatprep.subr.mxu0 %v9765_v11  ;;  %8965 = vmatpush3.msra.mxu1 %v9903_v58  ;;  %v5800_v11 = vsel %vm190_vm1, %v8700_v27, 0  ;;  %v6355_v43 = vand.u32 4294901760, %v6354_v28 }
 0x115   : > { %8966 = vmatprep.mubr.msk.f32.mxu1 %vm9311_vm0, %v9309_v0  ;;  %8969 = vmatprep.subr.mxu1 %v9309_v0  ;;  %v9984_v31 = vand.u32 4294901760, %v5800_v11  ;;  %v3084_v38 = vsub.f32 %v9987_v7, %v3083_v26 }
 0x116   : > { %8967 = vmatmul.mubr.f32.vlgmr.msra.gmra.mrb[60].mxu1 %v9951_v20  ;;  %v6356_v49 = vsub.f32 %v6354_v28, %v6355_v43 }
 0x117   : > { %8970 = vmatpush3.msra.mxu1 %v5419_v24  ;;  %8971 = vmatprep.mubr.msk.f32.mxu1 %vm9311_vm0, %v9309_v0  ;;  %v3085_v45 = vand.u32 4294901760, %v3084_v38 }
 0x118   : > { %8974 = vmatprep.subr.mxu1 %v9309_v0  ;;  %v6357_v44 = vand.u32 4294901760, %v6356_v49  ;;  %v4868_v49 = vsel %vm194_vm3, %v9553_v61, 0 }
 0x11a   : > { %2444 = vmatmul.mubr.f32.vlgmr.msra.gmra.mrb[0].mxu0 %v9609_v18  ;;  %8972 = vmatmul.mubr.f32.vlgmr.msra.gmra.mrb[62].mxu1 %v9899_v9 }
 0x11b   : > { %2453 = vmatpush1.msra.mxu0 %v9796_v60  ;;  %2516 = vmatprep.mubr.f32.mxu0 %v9309_v0  ;;  %v10003_v60 = vsub.f32 %v5800_v11, %v9984_v31 }
 0x11c   : > { %2998 = vmatprep.subr.mxu0 %v9946_v22  ;;  %8975 = vmatpush3.msra.mxu1 %v9918_v10 }
 0x11d   : > { %8976 = vmatprep.mubr.msk.f32.mxu1 %vm9311_vm0, %v9309_v0  ;;  %8979 = vmatprep.subr.mxu1 %v9309_v0  ;;  %v10014_v37 = vand.u32 4294901760, %v10003_v60 }
 0x11e   : > { %8977 = vmatmul.mubr.f32.vlgmr.msra.gmra.mrb[64].mxu1 %v9912_v59 }
 0x11f   : > { %8980 = vmatpush3.msra.mxu1 %v9903_v58  ;;  %8981 = vmatprep.mubr.msk.f32.mxu1 %vm9311_vm0, %v9309_v0 }
 0x120   : > { %8984 = vmatprep.subr.mxu1 %v9309_v0 }
 0x122   : > { %2518 = vmatmul.mubr.f32.vlgmr.msra.gmra.mrb[0].mxu0 %v9609_v18  ;;  %8982 = vmatmul.mubr.f32.vlgmr.msra.gmra.mrb[66].mxu1 %v9928_v14  ;;  %v5881_v18 = vsub.f32 %v10003_v60, %v10014_v37 }
 0x123   : > { %3000 = vmatpush1.msra.mxu0 %v9974_v46  ;;  %3063 = vmatprep.mubr.f32.mxu0 %v9309_v0 }
 0x124   : > { %3080 = vmatprep.subr.mxu0 %v3079_v30  ;;  %8985 = vmatpush3.msra.mxu1 %v5417_v17  ;;  %v10033_v57 = vand.u32 4294901760, %v5881_v18 }
 0x125   : > { %8986 = vmatprep.mubr.msk.f32.mxu1 %vm9311_vm0, %v9309_v0  ;;  %8989 = vmatprep.subr.mxu1 %v9309_v0 }
 0x126   : > { %8987 = vmatmul.mubr.f32.vlgmr.msra.gmra.mrb[68].mxu1 %v9899_v9 }
 0x127   : > { %8990 = vmatpush3.msra.mxu1 %v9903_v58  ;;  %8991 = vmatprep.mubr.msk.f32.mxu1 %vm9311_vm0, %v9309_v0  ;;  %v10056_v58 = vand.u32 4294901760, %v6738_v3 }
 0x128   : > { %8994 = vmatprep.subr.mxu1 %v9309_v0 }
 0x12a   : > { %3069 = vmatmul.mubr.f32.vlgmr.msra.gmra.mrb[0].mxu0 %v9774_v13  ;;  %8992 = vmatmul.mubr.f32.vlgmr.msra.gmra.mrb[70].mxu1 %v9899_v9  ;;  %v6734_v13 = vsel %vm6731_vm9, %v9736_v5, %v9738_v56  ;;  %v10068_v56 = vsub.f32 %v6738_v3, %v10056_v58 }
 0x12b   : > { %3086 = vmatpush1.msra.mxu0 %v3085_v45  ;;  %3149 = vmatprep.mubr.f32.mxu0 %v9309_v0  ;;  %v6747_v6 = vsel %vm194_vm3, %v6734_v13, 0  ;;  %v9319_v45 = vmov 0  }
 0x12c   : > { %3159 = vmatprep.subr.mxu0 %v9957_v4  ;;  %8995 = vmatpush3.msra.mxu1 %v9991_v23  ;;  %v10060_v5 = vand.u32 4294901760, %v6747_v6  ;;  %v10080_v1 = vand.u32 4294901760, %v10068_v56  ;;  %v3927_v4 = vsel %vm194_vm3, %v9508_v50, 0  ;;  %v7672_v50 = vsel %vm7669_vm10, %v9849_v52, %v9847_v40 }
 0x12d   : > { %8996 = vmatprep.mubr.msk.f32.mxu1 %vm9311_vm0, %v9309_v0  ;;  %8999 = vmatprep.subr.mxu1 %v9309_v0  ;;  %v10127_v27 = vand.u32 4294901760, %v3927_v4  ;;  %v7685_v11 = vsel %vm194_vm3, %v7672_v50, 0 }
 0x12e   : > { %8997 = vmatmul.mubr.f32.vlgmr.msra.gmra.mrb[72].mxu1 %v10033_v57  ;;  %v10074_v10 = vsub.f32 %v6747_v6, %v10060_v5  ;;  %v10144_v52 = vand.u32 4294901760, %v7685_v11  ;;  %9243 = vset.pattern.permute.xlu0 %v9319_v45 }
 0x12f   : > { %9000 = vmatpush3.msra.mxu1 %v6357_v44  ;;  %9001 = vmatprep.mubr.msk.f32.mxu1 %vm9311_vm0, %v9309_v0  ;;  %v10140_v40 = vsub.f32 %v3927_v4, %v10127_v27  ;;  %v4865_v44 = vsel %vm194_vm3, %v9558_v62, 0 }
 0x130   : > { %9004 = vmatprep.subr.mxu1 %v9309_v0  ;;  %v7293_v17 = vand.u32 4294901760, %v10074_v10  ;;  %v10240_v13 = vand.u32 4294901760, %v4865_v44 }
 0x131   : > { %v4021_v16 = vand.u32 4294901760, %v10140_v40 }
 0x132   : > { %3151 = vmatmul.mubr.f32.vlgmr.msra.gmra.mrb[0].mxu0 %v9701_v47  ;;  %9002 = vmatmul.mubr.f32.vlgmr.msra.gmra.mrb[74].mxu1 %v9984_v31  ;;  %v7294_v32 = vsub.f32 %v10074_v10, %v7293_v17 }
 0x133   : > { %3162 = vmatpush1.msra.mxu0 %v9987_v7  ;;  %3225 = vmatprep.mubr.f32.mxu0 %v9309_v0  ;;  %v8230_v7 = vsub.f32 %v7685_v11, %v10144_v52 }
 0x134   : > { %3235 = vmatprep.subr.mxu0 %v9946_v22  ;;  %9005 = vmatpush3.msra.mxu1 %v6354_v28  ;;  %v7295_v24 = vand.u32 4294901760, %v7294_v32 }
 0x135   : > { %9006 = vmatprep.mubr.msk.f32.mxu1 %vm9311_vm0, %v9309_v0  ;;  %9009 = vmatprep.subr.mxu1 %v9309_v0  ;;  %v8231_v28 = vand.u32 4294901760, %v8230_v7 }
 0x136   : > { %9007 = vmatmul.mubr.f32.vlgmr.msra.gmra.mrb[76].mxu1 %v10003_v60 }
 0x137   : > { %9010 = vmatpush3.msra.mxu1 %v9991_v23  ;;  %9011 = vmatprep.mubr.msk.f32.mxu1 %vm9311_vm0, %v9309_v0  ;;  %v8232_v38 = vsub.f32 %v8230_v7, %v8231_v28 }
 0x138   : > { %9014 = vmatprep.subr.mxu1 %v9309_v0 }
 0x139   : > { %v8233_v18 = vand.u32 4294901760, %v8232_v38 }
 0x13a   : > { %3228 = vmatmul.mubr.f32.vlgmr.msra.gmra.mrb[0].mxu0 %v9714_v54  ;;  %9012 = vmatmul.mubr.f32.vlgmr.msra.gmra.mrb[78].mxu1 %v10014_v37  ;;  %v6819_v54 = vsub.f32 %v10068_v56, %v10080_v1 }
 0x13b   : > { %3237 = vmatpush1.msra.mxu0 %v9974_v46  ;;  %3300 = vmatprep.mubr.f32.mxu0 %v9309_v0 }
 0x13c   : > { %3313 = vmatprep.subr.mxu0 %v3077_v51  ;;  %9015 = vmatpush3.msra.mxu1 %v6355_v43  ;;  %v10104_v53 = vand.u32 4294901760, %v6819_v54  ;;  %v4016_v51 = vsub.f32 %v10112_v19, %v4015_v21 }
 0x13d   : > { %9016 = vmatprep.mubr.msk.f32.mxu1 %vm9311_vm0, %v9309_v0  ;;  %9019 = vmatprep.subr.mxu1 %v9309_v0 }
 0x13e   : > { %9017 = vmatmul.mubr.f32.vlgmr.msra.gmra.mrb[80].mxu1 %v9984_v31 }
 0x13f   : > { %9020 = vmatpush3.msra.mxu1 %v9991_v23  ;;  %9021 = vmatprep.mubr.msk.f32.mxu1 %vm9311_vm0, %v9309_v0  ;;  %v4017_v23 = vand.u32 4294901760, %v4016_v51 }
 0x140   : > { %9024 = vmatprep.subr.mxu1 %v9309_v0 }
 0x142   : > { %3304 = vmatmul.mubr.f32.vlgmr.msra.gmra.mrb[0].mxu0 %v9730_v63  ;;  %9022 = vmatmul.mubr.f32.vlgmr.msra.gmra.mrb[82].mxu1 %v9984_v31  ;;  %v8702_v63 = vld [vmem:[%s10397_s1 + $0x40] sm:$0xff] }
 0x143   : > { %3317 = vmatpush1.msra.mxu0 %v3083_v26  ;;  %3380 = vmatprep.mubr.f32.mxu0 %v9309_v0  ;;  %v4022_v26 = vsub.f32 %v10140_v40, %v4021_v16 }
 0x144   : > { %3389 = vmatprep.subr.mxu0 %v9946_v22  ;;  %9025 = vmatpush3.msra.mxu1 %v10060_v5  ;;  %v7676_v22 = vsel %vm190_vm1, %v8702_v63, 0 }
 0x145   : > { %9026 = vmatprep.mubr.msk.f32.mxu1 %vm9311_vm0, %v9309_v0  ;;  %9029 = vmatprep.subr.mxu1 %v9309_v0  ;;  %v10137_v8 = vand.u32 4294901760, %v7676_v22  ;;  %v4023_v30 = vand.u32 4294901760, %v4022_v26 }
 0x146   : > { %9027 = vmatmul.mubr.f32.vlgmr.msra.gmra.mrb[84].mxu1 %v10104_v53 }
 0x147   : > { %9030 = vmatpush3.msra.mxu1 %v7295_v24  ;;  %9031 = vmatprep.mubr.msk.f32.mxu1 %vm9311_vm0, %v9309_v0 }
 0x148   : > { %9034 = vmatprep.subr.mxu1 %v9309_v0 }
 0x14a   : > { %3382 = vmatmul.mubr.f32.vlgmr.msra.gmra.mrb[0].mxu0 %v9701_v47  ;;  %9032 = vmatmul.mubr.f32.vlgmr.msra.gmra.mrb[86].mxu1 %v10056_v58 }
 0x14b   : > { %3391 = vmatpush1.msra.mxu0 %v9974_v46  ;;  %3454 = vmatprep.mubr.f32.mxu0 %v9309_v0  ;;  %v10156_v46 = vsub.f32 %v7676_v22, %v10137_v8 }
 0x14c   : > { %3936 = vmatprep.subr.mxu0 %v10099_v36  ;;  %9035 = vmatpush3.msra.mxu1 %v10074_v10 }
 0x14d   : > { %9036 = vmatprep.mubr.msk.f32.mxu1 %vm9311_vm0, %v9309_v0  ;;  %9039 = vmatprep.subr.mxu1 %v9309_v0  ;;  %v10167_v25 = vand.u32 4294901760, %v10156_v46 }
 0x14e   : > { %9037 = vmatmul.mubr.f32.vlgmr.msra.gmra.mrb[88].mxu1 %v10068_v56 }
 0x14f   : > { %9040 = vmatpush3.msra.mxu1 %v10060_v5  ;;  %9041 = vmatprep.mubr.msk.f32.mxu1 %vm9311_vm0, %v9309_v0 }
 0x150   : > { %9044 = vmatprep.subr.mxu1 %v9309_v0 }
 0x152   : > { %3456 = vmatmul.mubr.f32.vlgmr.msra.gmra.mrb[0].mxu0 %v9701_v47  ;;  %9042 = vmatmul.mubr.f32.vlgmr.msra.gmra.mrb[90].mxu1 %v10080_v1  ;;  %v7757_v47 = vsub.f32 %v10156_v46, %v10167_v25 }
 0x153   : > { %3938 = vmatpush1.msra.mxu0 %v10127_v27  ;;  %4001 = vmatprep.mubr.f32.mxu0 %v9309_v0 }
 0x154   : > { %4018 = vmatprep.subr.mxu0 %v4017_v23  ;;  %9045 = vmatpush3.msra.mxu1 %v7293_v17  ;;  %v10186_v43 = vand.u32 4294901760, %v7757_v47  ;;  %v4958_v17 = vsub.f32 %v4865_v44, %v10240_v13  ;;  %v5806_v44 = vsel %vm194_vm3, %v9664_v34, 0 }
 0x155   : > { %9046 = vmatprep.mubr.msk.f32.mxu1 %vm9311_vm0, %v9309_v0  ;;  %9049 = vmatprep.subr.mxu1 %v9309_v0 }
 0x156   : > { %9047 = vmatmul.mubr.f32.vlgmr.msra.gmra.mrb[92].mxu1 %v10056_v58  ;;  %v4959_v4 = vand.u32 4294901760, %v4958_v17 }
 0x157   : > { %9050 = vmatpush3.msra.mxu1 %v10060_v5  ;;  %9051 = vmatprep.mubr.msk.f32.mxu1 %vm9311_vm0, %v9309_v0 }
 0x158   : > { %9054 = vmatprep.subr.mxu1 %v9309_v0 }
 0x15a   : > { %4007 = vmatmul.mubr.f32.vlgmr.msra.gmra.mrb[0].mxu0 %v9876_v55  ;;  %9052 = vmatmul.mubr.f32.vlgmr.msra.gmra.mrb[94].mxu1 %v10056_v58  ;;  %v8601_v55 = vld [vmem:[%s10398_s2] sm:$0xff] }
 0x15b   : > { %4024 = vmatpush1.msra.mxu0 %v4023_v30  ;;  %4087 = vmatprep.mubr.f32.mxu0 %v9309_v0 }
 0x15c   : > { %4097 = vmatprep.subr.mxu0 %v10112_v19  ;;  %9055 = vmatpush3.msra.mxu1 %v10144_v52 }
 0x15d   : > { %9056 = vmatprep.mubr.msk.f32.mxu1 %vm9311_vm0, %v9309_v0  ;;  %9059 = vmatprep.subr.mxu1 %v9309_v0 }
 0x15e   : > { %9057 = vmatmul.mubr.f32.vlgmr.msra.gmra.mrb[96].mxu1 %v10186_v43  ;;  %8604 = vperm.xlu0 %9243, %v8601_v55  }
 0x15f   : > { %9060 = vmatpush3.msra.mxu1 %v8233_v18  ;;  %9061 = vmatprep.mubr.msk.f32.mxu1 %vm9311_vm0, %v9309_v0 }
 0x160   : > { %9064 = vmatprep.subr.mxu1 %v9309_v0 }
 0x162   : > { %4089 = vmatmul.mubr.f32.vlgmr.msra.gmra.mrb[0].mxu0 %v9806_v48  ;;  %9062 = vmatmul.mubr.f32.vlgmr.msra.gmra.mrb[98].mxu1 %v10137_v8 }
 0x163   : > { %4100 = vmatpush1.msra.mxu0 %v10140_v40  ;;  %4163 = vmatprep.mubr.f32.mxu0 %v9309_v0 }
 0x164   : > { %4173 = vmatprep.subr.mxu0 %v10099_v36  ;;  %9065 = vmatpush3.msra.mxu1 %v8230_v7 }
 0x165   : > { %9066 = vmatprep.mubr.msk.f32.mxu1 %vm9311_vm0, %v9309_v0  ;;  %9069 = vmatprep.subr.mxu1 %v9309_v0 }
 0x166   : > { %9067 = vmatmul.mubr.f32.vlgmr.msra.gmra.mrb[100].mxu1 %v10156_v46 }
 0x167   : > { %9070 = vmatpush3.msra.mxu1 %v10144_v52  ;;  %9071 = vmatprep.mubr.msk.f32.mxu1 %vm9311_vm0, %v9309_v0 }
 0x168   : > { %9074 = vmatprep.subr.mxu1 %v9309_v0 }
 0x16a   : > { %4166 = vmatmul.mubr.f32.vlgmr.msra.gmra.mrb[0].mxu0 %v9825_v12  ;;  %9072 = vmatmul.mubr.f32.vlgmr.msra.gmra.mrb[102].mxu1 %v10167_v25  ;;  %v10229_v12 = vand.u32 4294901760, %v4868_v49 }
 0x16b   : > { %4175 = vmatpush1.msra.mxu0 %v10127_v27  ;;  %4238 = vmatprep.mubr.f32.mxu0 %v9309_v0 }
 0x16c   : > { %4251 = vmatprep.subr.mxu0 %v4015_v21  ;;  %9075 = vmatpush3.msra.mxu1 %v8231_v28  ;;  %v4952_v61 = vsub.f32 %v4868_v49, %v10229_v12  ;;  %v741_v39 = vpop.f32.mrb[0].mxu1 }
 0x16d   : > { %9076 = vmatprep.mubr.msk.f32.mxu1 %vm9311_vm0, %v9309_v0  ;;  %9079 = vmatprep.subr.mxu1 %v9309_v0  ;;  %v8818_v3 = vpop.f32.mrb[1].mxu1 }
 0x16e   : > { %9077 = vmatmul.mubr.f32.vlgmr.msra.gmra.mrb[104].mxu1 %v10137_v8  ;;  %v4953_v6 = vand.u32 4294901760, %v4952_v61 }
 0x16f   : > { %9080 = vmatpush3.msra.mxu1 %v10144_v52  ;;  %9081 = vmatprep.mubr.msk.f32.mxu1 %vm9311_vm0, %v9309_v0 }
 0x170   : > { %v4954_v62 = vsub.f32 %v4952_v61, %v4953_v6 }
 0x172   : > { %4242 = vmatmul.mubr.f32.vlgmr.msra.gmra.mrb[0].mxu0 %v9838_v35  ;;  %9082 = vmatmul.mubr.f32.vlgmr.msra.gmra.mrb[106].mxu1 %v10137_v8  ;;  %v4955_v19 = vand.u32 4294901760, %v4954_v62 }
 0x173   : > { %4255 = vmatpush1.msra.mxu0 %v4021_v16  ;;  %4318 = vmatprep.mubr.f32.mxu0 %v9309_v0 }
 0x174   : > { %4327 = vmatprep.subr.mxu0 %v10099_v36  ;;  %v817_v35 = vpop.f32.mrb[2].mxu1 }
 0x175   : > { %v8823_v5 = vpop.f32.mrb[3].mxu1  ;;  %v818_v54 = vadd.f32 %v817_v35, %v741_v39 }
 0x176   : > { %v10260_v5 = vand.u32 4294901760, %v5806_v44 }
 0x179   : > { %v891_v10 = vpop.f32.mrb[4].mxu1 }
 0x17a   : > { %4320 = vmatmul.mubr.f32.vlgmr.msra.gmra.mrb[0].mxu0 %v9806_v48  ;;  %v8828_v15 = vpop.f32.mrb[5].mxu1  ;;  %v892_v36 = vadd.f32 %v891_v10, %v818_v54 }
 0x17b   : > { %4329 = vmatpush1.msra.mxu0 %v10127_v27  ;;  %4392 = vmatprep.mubr.f32.mxu0 %v9309_v0  ;;  %v4960_v27 = vsub.f32 %v4958_v17, %v4959_v4 }
 0x17c   : > { %4874 = vmatprep.subr.mxu0 %v10229_v12 }
 0x17d   : > { %v965_v32 = vpop.f32.mrb[6].mxu1  ;;  %v4961_v51 = vand.u32 4294901760, %v4960_v27 }
 0x17e   : > { %v8833_v24 = vpop.f32.mrb[7].mxu1  ;;  %v966_v63 = vadd.f32 %v965_v32, %v892_v36 }
 0x181   : > { %v1039_v50 = vpop.f32.mrb[8].mxu1 }
 0x182   : > { %4394 = vmatmul.mubr.f32.vlgmr.msra.gmra.mrb[0].mxu0 %v9806_v48  ;;  %v8838_v22 = vpop.f32.mrb[9].mxu1  ;;  %v1040_v21 = vadd.f32 %v1039_v50, %v966_v63 }
 0x183   : > { %4876 = vmatpush1.msra.mxu0 %v10240_v13  ;;  %4939 = vmatprep.mubr.f32.mxu0 %v9309_v0 }
 0x184   : > { %4956 = vmatprep.subr.mxu0 %v4955_v19 }
 0x185   : > { %v1111_v11 = vpop.f32.mrb[10].mxu1 }
 0x186   : > { %v1112_v40 = vadd.f32 %v1111_v11, %v1040_v21  ;;  %v8843_v52 = vpop.f32.mrb[11].mxu1 }
 0x189   : > { %v1661_v16 = vpop.f32.mrb[12].mxu1 }
 0x18a   : > { %4945 = vmatmul.mubr.f32.vlgmr.msra.gmra.mrb[0].mxu0 %v9951_v20  ;;  %v1662_v7 = vadd.f32 %v1661_v16, %v1112_v40  ;;  %v8848_v23 = vpop.f32.mrb[13].mxu1 }
 0x18b   : > { %4962 = vmatpush1.msra.mxu0 %v4961_v51  ;;  %5025 = vmatprep.mubr.f32.mxu0 %v9309_v0 }
 0x18c   : > { %5035 = vmatprep.subr.mxu0 %v4952_v61 }
 0x18d   : > { %v1737_v48 = vpop.f32.mrb[14].mxu1 }
 0x18e   : > { %v1738_v26 = vadd.f32 %v1737_v48, %v1662_v7  ;;  %v8853_v28 = vpop.f32.mrb[15].mxu1 }
 0x191   : > { %v1811_v47 = vpop.f32.mrb[16].mxu1 }
 0x192   : > { %5027 = vmatmul.mubr.f32.vlgmr.msra.gmra.mrb[0].mxu0 %v9899_v9  ;;  %v1812_v30 = vadd.f32 %v1811_v47, %v1738_v26  ;;  %v8858_v38 = vpop.f32.mrb[17].mxu1 }
 0x193   : > { %5038 = vmatpush1.msra.mxu0 %v4958_v17  ;;  %5101 = vmatprep.mubr.f32.mxu0 %v9309_v0 }
 0x194   : > { %5111 = vmatprep.subr.mxu0 %v10229_v12 }
 0x195   : > { %v1885_v20 = vpop.f32.mrb[18].mxu1 }
 0x196   : > { %v1886_v18 = vadd.f32 %v1885_v20, %v1812_v30  ;;  %v8863_v55 = vpop.f32.mrb[19].mxu1 }
 0x199   : > { %v1959_v45 = vpop.f32.mrb[20].mxu1 }
 0x19a   : > { %5104 = vmatmul.mubr.f32.vlgmr.msra.gmra.mrb[0].mxu0 %v9912_v59  ;;  %v1960_v49 = vadd.f32 %v1959_v45, %v1886_v18  ;;  %v8868_v61 = vpop.f32.mrb[21].mxu1  ;;  %v5803_v59 = vsel %vm194_vm3, %v9659_v33, 0 }
 0x19b   : > { %5113 = vmatpush1.msra.mxu0 %v10240_v13  ;;  %5176 = vmatprep.mubr.f32.mxu0 %v9309_v0  ;;  %v10268_v54 = vand.u32 4294901760, %v5803_v59  ;;  %v6744_v61 = vsel %vm194_vm3, %v9745_v29, 0 }
 0x19c   : > { %5189 = vmatprep.subr.mxu0 %v4953_v6  ;;  %v5890_v6 = vsub.f32 %v5806_v44, %v10260_v5 }
 0x19d   : > { %v2031_v39 = vpop.f32.mrb[22].mxu1 }
 0x19e   : > { %v2032_v3 = vadd.f32 %v2031_v39, %v1960_v49  ;;  %v8873_v35 = vpop.f32.mrb[23].mxu1  ;;  %v5891_v32 = vand.u32 4294901760, %v5890_v6 }
 0x19f   : > { %v10288_v35 = vand.u32 4294901760, %v6744_v61 }
 0x1a0   : > { %v5892_v33 = vsub.f32 %v5890_v6, %v5891_v32 }
 0x1a1   : > { %v2596_v10 = vpop.f32.mrb[24].mxu1 }
 0x1a2   : > { %5180 = vmatmul.mubr.f32.vlgmr.msra.gmra.mrb[0].mxu0 %v9928_v14  ;;  %v8878_v17 = vpop.f32.mrb[25].mxu1  ;;  %v5893_v22 = vand.u32 4294901760, %v5892_v33 }
 0x1a3   : > { %5193 = vmatpush1.msra.mxu0 %v4959_v4  ;;  %5256 = vmatprep.mubr.f32.mxu0 %v9309_v0  ;;  %v5896_v4 = vsub.f32 %v5803_v59, %v10268_v54  ;;  %v6828_v59 = vsub.f32 %v6744_v61, %v10288_v35 }
 0x1a4   : > { %5265 = vmatprep.subr.mxu0 %v10229_v12 }
 0x1a5   : > { %v2672_v34 = vpop.f32.mrb[26].mxu1  ;;  %v5897_v50 = vand.u32 4294901760, %v5896_v4 }
 0x1a6   : > { %v2673_v15 = vadd.f32 %v2672_v34, %v2596_v10  ;;  %v8883_v62 = vpop.f32.mrb[27].mxu1 }
 0x1a9   : > { %v2746_v36 = vpop.f32.mrb[28].mxu1 }
 0x1aa   : > { %5258 = vmatmul.mubr.f32.vlgmr.msra.gmra.mrb[0].mxu0 %v9899_v9  ;;  %v2747_v14 = vadd.f32 %v2746_v36, %v2673_v15  ;;  %v8888_v24 = vpop.f32.mrb[29].mxu1 }
 0x1ab   : > { %5267 = vmatpush1.msra.mxu0 %v10240_v13  ;;  %5330 = vmatprep.mubr.f32.mxu0 %v9309_v0  ;;  %v5898_v13 = vsub.f32 %v5896_v4, %v5897_v50 }
 0x1ac   : > { %5812 = vmatprep.subr.mxu0 %v10260_v5 }
 0x1ad   : > { %v2820_v12 = vpop.f32.mrb[30].mxu1  ;;  %v5899_v16 = vand.u32 4294901760, %v5898_v13 }
 0x1ae   : > { %v2821_v19 = vadd.f32 %v2820_v12, %v2747_v14  ;;  %v8893_v63 = vpop.f32.mrb[31].mxu1 }
 0x1b1   : > { %v2894_v27 = vpop.f32.mrb[32].mxu1 }
 0x1b2   : > { %5332 = vmatmul.mubr.f32.vlgmr.msra.gmra.mrb[0].mxu0 %v9899_v9  ;;  %v2895_v21 = vadd.f32 %v2894_v27, %v2821_v19  ;;  %v8898_v11 = vpop.f32.mrb[33].mxu1 }
 0x1b3   : > { %5814 = vmatpush1.msra.mxu0 %v10268_v54  ;;  %5877 = vmatprep.mubr.f32.mxu0 %v9309_v0 }
 0x1b4   : > { %5894 = vmatprep.subr.mxu0 %v5893_v22 }
 0x1b5   : > { %v2966_v40 = vpop.f32.mrb[34].mxu1 }
 0x1b6   : > { %v2967_v52 = vadd.f32 %v2966_v40, %v2895_v21  ;;  %v8903_v51 = vpop.f32.mrb[35].mxu1 }
 0x1b8   : > { %v2972_v7 = vadd.f32 %v2967_v52, %v2032_v3 }
 0x1b9   : > { %v3534_v23 = vpop.f32.mrb[36].mxu1 }
 0x1ba   : > { %5883 = vmatmul.mubr.f32.vlgmr.msra.gmra.mrb[0].mxu0 %v10033_v57  ;;  %v8908_v48 = vpop.f32.mrb[37].mxu1 }
 0x1bb   : > { %5900 = vmatpush1.msra.mxu0 %v5899_v16  ;;  %5963 = vmatprep.mubr.f32.mxu0 %v9309_v0 }
 0x1bc   : > { %5973 = vmatprep.subr.mxu0 %v5890_v6  ;;  %v6741_v6 = vsel %vm194_vm3, %v9750_v2, 0 }
 0x1bd   : > { %v3610_v9 = vpop.f32.mrb[38].mxu1  ;;  %v10296_v62 = vand.u32 4294901760, %v6741_v6 }
 0x1be   : > { %v3611_v26 = vadd.f32 %v3610_v9, %v3534_v23  ;;  %v8913_v28 = vpop.f32.mrb[39].mxu1 }
 0x1bf   : > { %v6834_v24 = vsub.f32 %v6741_v6, %v10296_v62 }
 0x1c1   : > { %v3684_v47 = vpop.f32.mrb[40].mxu1  ;;  %v6835_v12 = vand.u32 4294901760, %v6834_v24 }
 0x1c2   : > { %5965 = vmatmul.mubr.f32.vlgmr.msra.gmra.mrb[0].mxu0 %v9984_v31  ;;  %v3685_v30 = vadd.f32 %v3684_v47, %v3611_v26  ;;  %v8918_v38 = vpop.f32.mrb[41].mxu1 }
 0x1c3   : > { %5976 = vmatpush1.msra.mxu0 %v5896_v4  ;;  %6039 = vmatprep.mubr.f32.mxu0 %v9309_v0 }
 0x1c4   : > { %6049 = vmatprep.subr.mxu0 %v10260_v5 }
 0x1c5   : > { %v3758_v20 = vpop.f32.mrb[42].mxu1 }
 0x1c6   : > { %v3759_v57 = vadd.f32 %v3758_v20, %v3685_v30  ;;  %v8923_v18 = vpop.f32.mrb[43].mxu1  ;;  %v7682_v20 = vsel %vm194_vm3, %v9861_v42, 0 }
 0x1c9   : > { %v3832_v55 = vpop.f32.mrb[44].mxu1 }
 0x1ca   : > { %6042 = vmatmul.mubr.f32.vlgmr.msra.gmra.mrb[0].mxu0 %v10003_v60  ;;  %v3833_v45 = vadd.f32 %v3832_v55, %v3759_v57  ;;  %v8928_v49 = vpop.f32.mrb[45].mxu1 }
 0x1cb   : > { %6051 = vmatpush1.msra.mxu0 %v10268_v54  ;;  %6114 = vmatprep.mubr.f32.mxu0 %v9309_v0 }
 0x1cc   : > { %6127 = vmatprep.subr.mxu0 %v5891_v32  ;;  %v6829_v32 = vand.u32 4294901760, %v6828_v59 }
 0x1cd   : > { %v3904_v44 = vpop.f32.mrb[46].mxu1 }
 0x1ce   : > { %v3905_v39 = vadd.f32 %v3904_v44, %v3833_v45  ;;  %v8933_v3 = vpop.f32.mrb[47].mxu1  ;;  %v6830_v2 = vsub.f32 %v6828_v59, %v6829_v32  ;;  %v10316_v45 = vand.u32 4294901760, %v7682_v20  ;;  %v7679_v44 = vsel %vm194_vm3, %v9856_v41, 0 }
 0x1d0   : > { %v3910_v10 = vadd.f32 %v3905_v39, %v2972_v7  ;;  %v6831_v19 = vand.u32 4294901760, %v6830_v2  ;;  %v7766_v39 = vsub.f32 %v7682_v20, %v10316_v45 }
 0x1d1   : > { %v4472_v17 = vpop.f32.mrb[48].mxu1 }
 0x1d2   : > { %6118 = vmatmul.mubr.f32.vlgmr.msra.gmra.mrb[0].mxu0 %v10014_v37  ;;  %v8938_v60 = vpop.f32.mrb[49].mxu1 }
 0x1d3   : > { %6131 = vmatpush1.msra.mxu0 %v5897_v50  ;;  %6194 = vmatprep.mubr.f32.mxu0 %v9309_v0  ;;  %v7767_v60 = vand.u32 4294901760, %v7766_v39 }
 0x1d4   : > { %6203 = vmatprep.subr.mxu0 %v10260_v5 }
 0x1d5   : > { %v4548_v29 = vpop.f32.mrb[50].mxu1  ;;  %v7768_v41 = vsub.f32 %v7766_v39, %v7767_v60 }
 0x1d6   : > { %v4549_v34 = vadd.f32 %v4548_v29, %v4472_v17  ;;  %v8943_v15 = vpop.f32.mrb[51].mxu1  ;;  %v10324_v17 = vand.u32 4294901760, %v7679_v44 }
 0x1d8   : > { %v7772_v29 = vsub.f32 %v7679_v44, %v10324_v17 }
 0x1d9   : > { %v4622_v36 = vpop.f32.mrb[52].mxu1 }
 0x1da   : > { %6196 = vmatmul.mubr.f32.vlgmr.msra.gmra.mrb[0].mxu0 %v9984_v31  ;;  %v4623_v37 = vadd.f32 %v4622_v36, %v4549_v34  ;;  %v8948_v14 = vpop.f32.mrb[53].mxu1  ;;  %v7769_v36 = vand.u32 4294901760, %v7768_v41 }
 0x1db   : > { %6205 = vmatpush1.msra.mxu0 %v10268_v54  ;;  %6268 = vmatprep.mubr.f32.mxu0 %v9309_v0  ;;  %v6836_v54 = vsub.f32 %v6834_v24, %v6835_v12 }
 0x1dc   : > { %6750 = vmatprep.subr.mxu0 %v10288_v35 }
 0x1dd   : > { %v4696_v5 = vpop.f32.mrb[54].mxu1  ;;  %v6837_v13 = vand.u32 4294901760, %v6836_v54 }
 0x1de   : > { %v4697_v4 = vadd.f32 %v4696_v5, %v4623_v37  ;;  %v8953_v33 = vpop.f32.mrb[55].mxu1 }
 0x1e1   : > { %v4770_v63 = vpop.f32.mrb[56].mxu1 }
 0x1e2   : > { %6270 = vmatmul.mubr.f32.vlgmr.msra.gmra.mrb[0].mxu0 %v9984_v31  ;;  %v4771_v50 = vadd.f32 %v4770_v63, %v4697_v4  ;;  %v8958_v22 = vpop.f32.mrb[57].mxu1 }
 0x1e3   : > { %6752 = vmatpush1.msra.mxu0 %v10296_v62  ;;  %6815 = vmatprep.mubr.f32.mxu0 %v9309_v0 }
 0x1e4   : > { %6832 = vmatprep.subr.mxu0 %v6831_v19 }
 0x1e5   : > { %v4842_v27 = vpop.f32.mrb[58].mxu1 }
 0x1e6   : > { %v4843_v21 = vadd.f32 %v4842_v27, %v4771_v50  ;;  %v8963_v11 = vpop.f32.mrb[59].mxu1 }
 0x1e8   : > { %v4848_v40 = vadd.f32 %v4843_v21, %v3910_v10 }
 0x1e9   : > { %v5410_v52 = vpop.f32.mrb[60].mxu1 }
 0x1ea   : > { %6821 = vmatmul.mubr.f32.vlgmr.msra.gmra.mrb[0].mxu0 %v10104_v53  ;;  %v8968_v51 = vpop.f32.mrb[61].mxu1 }
 0x1eb   : > { %6838 = vmatpush1.msra.mxu0 %v6837_v13  ;;  %6901 = vmatprep.mubr.f32.mxu0 %v9309_v0 }
 0x1ec   : > { %6911 = vmatprep.subr.mxu0 %v6828_v59 }
 0x1ed   : > { %v5486_v31 = vpop.f32.mrb[62].mxu1 }
 0x1ee   : > { %v5487_v16 = vadd.f32 %v5486_v31, %v5410_v52  ;;  %v8973_v7 = vpop.f32.mrb[63].mxu1 }
 0x1f1   : > { %v5560_v23 = vpop.f32.mrb[64].mxu1 }
 0x1f2   : > { %6903 = vmatmul.mubr.f32.vlgmr.msra.gmra.mrb[0].mxu0 %v10056_v58  ;;  %v5561_v48 = vadd.f32 %v5560_v23, %v5487_v16  ;;  %v8978_v9 = vpop.f32.mrb[65].mxu1 }
 0x1f3   : > { %6914 = vmatpush1.msra.mxu0 %v6834_v24  ;;  %6977 = vmatprep.mubr.f32.mxu0 %v9309_v0 }
 0x1f4   : > { %6987 = vmatprep.subr.mxu0 %v10288_v35 }
 0x1f5   : > { %v5634_v26 = vpop.f32.mrb[66].mxu1 }
 0x1f6   : > { %v5635_v53 = vadd.f32 %v5634_v26, %v5561_v48  ;;  %v8983_v28 = vpop.f32.mrb[67].mxu1 }
 0x1f9   : > { %v5708_v47 = vpop.f32.mrb[68].mxu1 }
 0x1fa   : > { %6980 = vmatmul.mubr.f32.vlgmr.msra.gmra.mrb[0].mxu0 %v10068_v56  ;;  %v5709_v30 = vadd.f32 %v5708_v47, %v5635_v53  ;;  %v8988_v38 = vpop.f32.mrb[69].mxu1 }
 0x1fb   : > { %6989 = vmatpush1.msra.mxu0 %v10296_v62  ;;  %7052 = vmatprep.mubr.f32.mxu0 %v9309_v0 }
 0x1fc   : > { %7065 = vmatprep.subr.mxu0 %v6829_v32  ;;  %v7773_v32 = vand.u32 4294901760, %v7772_v29 }
 0x1fd   : > { %v5780_v57 = vpop.f32.mrb[70].mxu1 }
 0x1fe   : > { %v5781_v18 = vadd.f32 %v5780_v57, %v5709_v30  ;;  %v8993_v55 = vpop.f32.mrb[71].mxu1 }
 0x200   : > { %v5786_v49 = vadd.f32 %v5781_v18, %v4848_v40 }
 0x201   : > { %v6348_v61 = vpop.f32.mrb[72].mxu1 }
 0x202   : > { %7056 = vmatmul.mubr.f32.vlgmr.msra.gmra.mrb[0].mxu0 %v10080_v1  ;;  %v8998_v56 = vpop.f32.mrb[73].mxu1 }
 0x203   : > { %7069 = vmatpush1.msra.mxu0 %v6835_v12  ;;  %7132 = vmatprep.mubr.f32.mxu0 %v9309_v0  ;;  %v8605_v56 = vpop.permute.xlu0 %8604 }
 0x204   : > { %7141 = vmatprep.subr.mxu0 %v10288_v35 }
 0x205   : > { %v6424_v42 = vpop.f32.mrb[74].mxu1 }
 0x206   : > { %v6425_v3 = vadd.f32 %v6424_v42, %v6348_v61  ;;  %v9003_v10 = vpop.f32.mrb[75].mxu1 }
 0x209   : > { %v6498_v59 = vpop.f32.mrb[76].mxu1 }
 0x20a   : > { %7134 = vmatmul.mubr.f32.vlgmr.msra.gmra.mrb[0].mxu0 %v10056_v58  ;;  %v6499_v1 = vadd.f32 %v6498_v59, %v6425_v3  ;;  %v9008_v6 = vpop.f32.mrb[77].mxu1 }
 0x20b   : > { %7143 = vmatpush1.msra.mxu0 %v10296_v62  ;;  %7206 = vmatprep.mubr.f32.mxu0 %v9309_v0  ;;  %v7774_v62 = vsub.f32 %v7772_v29, %v7773_v32 }
 0x20c   : > { %7688 = vmatprep.subr.mxu0 %v10316_v45 }
 0x20d   : > { %v6572_v35 = vpop.f32.mrb[78].mxu1  ;;  %v7775_v33 = vand.u32 4294901760, %v7774_v62 }
 0x20e   : > { %v6573_v34 = vadd.f32 %v6572_v35, %v6499_v1  ;;  %v9013_v15 = vpop.f32.mrb[79].mxu1 }
 0x211   : > { %v6646_v37 = vpop.f32.mrb[80].mxu1 }
 0x212   : > { %7208 = vmatmul.mubr.f32.vlgmr.msra.gmra.mrb[0].mxu0 %v10056_v58  ;;  %v6647_v14 = vadd.f32 %v6646_v37, %v6573_v34  ;;  %v9018_v24 = vpop.f32.mrb[81].mxu1 }
 0x213   : > { %7690 = vmatpush1.msra.mxu0 %v10324_v17  ;;  %7753 = vmatprep.mubr.f32.mxu0 %v9309_v0 }
 0x214   : > { %7770 = vmatprep.subr.mxu0 %v7769_v36 }
 0x215   : > { %v6718_v2 = vpop.f32.mrb[82].mxu1 }
 0x216   : > { %v6719_v5 = vadd.f32 %v6718_v2, %v6647_v14  ;;  %v9023_v4 = vpop.f32.mrb[83].mxu1 }
 0x218   : > { %v6724_v12 = vadd.f32 %v6719_v5, %v5786_v49 }
 0x219   : > { %v7286_v19 = vpop.f32.mrb[84].mxu1 }
 0x21a   : > { %7759 = vmatmul.mubr.f32.vlgmr.msra.gmra.mrb[0].mxu0 %v10186_v43  ;;  %v9028_v63 = vpop.f32.mrb[85].mxu1 }
 0x21b   : > { %7776 = vmatpush1.msra.mxu0 %v7775_v33  ;;  %7839 = vmatprep.mubr.f32.mxu0 %v9309_v0 }
 0x21c   : > { %7849 = vmatprep.subr.mxu0 %v7766_v39 }
 0x21d   : > { %v7362_v58 = vpop.f32.mrb[86].mxu1 }
 0x21e   : > { %v7363_v50 = vadd.f32 %v7362_v58, %v7286_v19  ;;  %v9033_v22 = vpop.f32.mrb[87].mxu1 }
 0x221   : > { %v7436_v54 = vpop.f32.mrb[88].mxu1 }
 0x222   : > { %7841 = vmatmul.mubr.f32.vlgmr.msra.gmra.mrb[0].mxu0 %v10137_v8  ;;  %v7437_v27 = vadd.f32 %v7436_v54, %v7363_v50  ;;  %v9038_v21 = vpop.f32.mrb[89].mxu1 }
 0x223   : > { %7852 = vmatpush1.msra.mxu0 %v7772_v29  ;;  %7915 = vmatprep.mubr.f32.mxu0 %v9309_v0 }
 0x224   : > { %7925 = vmatprep.subr.mxu0 %v10316_v45 }
 0x225   : > { %v7510_v11 = vpop.f32.mrb[90].mxu1 }
 0x226   : > { %v7511_v43 = vadd.f32 %v7510_v11, %v7437_v27  ;;  %v9043_v13 = vpop.f32.mrb[91].mxu1 }
 0x229   : > { %v7584_v40 = vpop.f32.mrb[92].mxu1 }
 0x22a   : > { %7918 = vmatmul.mubr.f32.vlgmr.msra.gmra.mrb[0].mxu0 %v10156_v46  ;;  %v7585_v52 = vadd.f32 %v7584_v40, %v7511_v43  ;;  %v9048_v51 = vpop.f32.mrb[93].mxu1 }
 0x22b   : > { %7927 = vmatpush1.msra.mxu0 %v10324_v17  ;;  %7990 = vmatprep.mubr.f32.mxu0 %v9309_v0 }
 0x22c   : > { %8003 = vmatprep.subr.mxu0 %v7767_v60 }
 0x22d   : > { %v7656_v31 = vpop.f32.mrb[94].mxu1 }
 0x22e   : > { %v7657_v16 = vadd.f32 %v7656_v31, %v7585_v52  ;;  %v9053_v7 = vpop.f32.mrb[95].mxu1 }
 0x230   : > { %v7662_v23 = vadd.f32 %v7657_v16, %v6724_v12 }
 0x231   : > { %v8224_v48 = vpop.f32.mrb[96].mxu1 }
 0x232   : > { %7994 = vmatmul.mubr.f32.vlgmr.msra.gmra.mrb[0].mxu0 %v10167_v25  ;;  %v9058_v9 = vpop.f32.mrb[97].mxu1 }
 0x233   : > { %8007 = vmatpush1.msra.mxu0 %v7773_v32  ;;  %8070 = vmatprep.mubr.f32.mxu0 %v9309_v0 }
 0x234   : > { %8079 = vmatprep.subr.mxu0 %v10316_v45 }
 0x235   : > { %v8300_v46 = vpop.f32.mrb[98].mxu1 }
 0x236   : > { %v8301_v26 = vadd.f32 %v8300_v46, %v8224_v48  ;;  %v9063_v53 = vpop.f32.mrb[99].mxu1 }
 0x239   : > { %v8374_v28 = vpop.f32.mrb[100].mxu1 }
 0x23a   : > { %8072 = vmatmul.mubr.f32.vlgmr.msra.gmra.mrb[0].mxu0 %v10137_v8  ;;  %v8375_v47 = vadd.f32 %v8374_v28, %v8301_v26  ;;  %v9068_v30 = vpop.f32.mrb[101].mxu1 }
 0x23b   : > { %8081 = vmatpush1.msra.mxu0 %v10324_v17  ;;  %8144 = vmatprep.mubr.f32.mxu0 %v9309_v0 }
 0x23d   : > { %v8448_v25 = vpop.f32.mrb[102].mxu1 }
 0x23e   : > { %v8449_v38 = vadd.f32 %v8448_v25, %v8375_v47  ;;  %v9073_v20 = vpop.f32.mrb[103].mxu1 }
 0x241   : > { %v8522_v57 = vpop.f32.mrb[104].mxu1 }
 0x242   : > { %8146 = vmatmul.mubr.f32.vlgmr.msra.gmra.mrb[0].mxu0 %v10137_v8  ;;  %v8523_v18 = vadd.f32 %v8522_v57, %v8449_v38  ;;  %v9078_v55 = vpop.f32.mrb[105].mxu1 }
 0x245   : > { %v8594_v45 = vpop.f32.mrb[106].mxu1 }
 0x246   : > { %v8595_v49 = vadd.f32 %v8594_v45, %v8523_v18  ;;  %v9083_v61 = vpop.f32.mrb[107].mxu1 }
 0x248   : > { %v8600_v44 = vadd.f32 %v8595_v49, %v7662_v23 }
 0x24a   : > { %v8609_v39 = vadd.f32 %v8605_v56, %v8600_v44 }
 0x24c   : > { %v8612_v42 = vmax.f32 %v8609_v39, 0.0 }
 0x24e   : > { %8615 = vst [vmem:[%s163_s20 + $0x10] sm:$0xff] %v8612_v42 }
 0x315   : > { %v8147_v0 = vpop.f32.mrb[0].mxu0 }
 0x316   : > { %v8607_v3 = vadd.f32 %v8605_v56, %v8147_v0  ;;  %v8149_v10 = vpop.f32.mrb[1].mxu0 }
 0x317   : > { %v8608_v8 = vadd.f32 %v8605_v56, %v8149_v10 }
 0x318   : > { %v8610_v17 = vmax.f32 %v8607_v3, 0.0 }
 0x319   : > { %v8611_v60 = vmax.f32 %v8608_v8, 0.0 }
 0x31a   : > { %8613 = vst [vmem:[%s163_s20] sm:$0xff] %v8610_v17 }
 0x31b   : > { %8614 = vst [vmem:[%s163_s20 + $0x8] sm:$0xff] %v8611_v60 }
 0x31c   : > { %9258 = shalt.err (!%p9255_p3)
}
 0x31d   : > { %s9259_s6 = scalar_lea.hbm %s10354_s28, 384  ;;  %s9263_s9 = scalar_lea.hbm %s10399_s3, 768 }
 0x31e   : > { %p9260_p4 = scmp.ne.s32.totalorder %s10354_s28, %s9259_s6  ;;  %p9264_p9 = scmp.lt.u32.totalorder %s10354_s28, %s10399_s3 }
 0x31f   : > { %p9265_p10 = scmp.lt.u32.totalorder %s9263_s9, %s9259_s6  ;;  %p9267_p12 = scmp.lt.u32.totalorder %s9259_s6, %s10354_s28 }
 0x320   : > { %p9261_p7 = pnand %p9260_p4, %p9379_p5 }
 0x321   : > { %p9266_p11 = por %p9265_p10, %p9264_p9 }
 0x322   : > { %p9262_p8 = pneg %p9261_p7 }
 0x323   : > { %p9268_p13 = por %p9267_p12, %p9266_p11 }
 0x325   : > { %p9269_p0 = pnand %p9268_p13, %p9262_p8 }
 0x327   : > { %9272 = shalt.err (!%p9269_p0)
}
 0x328   : > { %9193 = dma.vmem_to_hbm [thread:$0]  (%p9379_p5), %s10356_s25, 384, %s10354_s28, %s8617_s29  }
 0x329 PF: > { %p9199_p1 = scmp.ge.s32.totalorder %s9307_s15, 2  ;;  %s8643_s17 = sand.u32 1, %s9295_s12  }
 0x32a   : > { %s8644_s19 = scalar_lea.sflag [#allocation3], %s8643_s17 }
 0x32b   : > { %p9196_p2 = pnand %p9199_p1, %p9383_p6 }
 0x32d   : > { %9290 = dma.done.wait (!%p9196_p2), %s8644_s19, 384  }
 0x32e   : > { %9292 = vsyncadd (!%p9196_p2), %s8644_s19, 4294966912  ;;  %p13_p3 = scmp.ge.s32.totalorder %s9366_s18, 4   ;;  %s10402_s12 = smov %s9299_s13 }
 0x32f   : > { %s10403_s13 = smov %s9303_s14  ;;  %s10404_s14 = smov %s9377_s21 }
 0x330   : > { %s10405_s15 = smov %s9366_s18  ;;  %15 = sbr.rel (!%p13_p3) target bundleno = 3 (0x3), region = 75 }
 0x337   :  { %8649 = vsyncpa [#allocation3], 1 }
 0x338   :  { %8651 = vsyncpa [#allocation3 + $0x1], 1 }

</bundles_post_ra>
